<compile_context>
chip_gen: v6e
topology: v6e:2x2x1
jax: 0.10.0
libtpu: 0.0.40
codegen_flags: <defaults>
</compile_context>

<pallas_src>
import jax
import jax.numpy as jnp
from jax.experimental import pallas as pl
from jax.experimental.pallas import tpu as pltpu

LANES = 128


def _round_up(x, m):
    return (x + m - 1) // m * m


# ----------------------------- Pallas kernels ------------------------------ #

def _conv_pool_kernel(a_ref, w_ref, b_ref, o_ref):
    """Fused conv-as-matmul + bias + ReLU + 2x2 maxpool.

    a_ref: (4, TM, Kp) bf16  -- im2col patches, one slab per pool phase
    w_ref: (Kp, 128)  bf16   -- conv weight, K/out-channels zero-padded
    b_ref: (1, 128)   f32    -- bias, zero-padded
    o_ref: (TM, 128)  bf16   -- pooled activation rows = (n, ph, pw)
    """
    w = w_ref[...]
    y = jnp.dot(a_ref[0], w, preferred_element_type=jnp.float32)
    for p in range(1, 4):
        y = jnp.maximum(y, jnp.dot(a_ref[p], w, preferred_element_type=jnp.float32))
    # max(relu(x_p + b)) == relu(max_p(x_p) + b): add bias + ReLU once.
    o_ref[...] = jnp.maximum(y + b_ref[...], 0.0).astype(o_ref.dtype)


def _fc_stack_kernel(x_ref, w1_ref, b1_ref, w2_ref, b2_ref, w3_ref, b3_ref, o_ref):
    """fc1->relu->fc2->relu->fc3 fused; all widths padded to 128 lanes."""
    h = jnp.dot(x_ref[...], w1_ref[...], preferred_element_type=jnp.float32) + b1_ref[...]
    h = jnp.maximum(h, 0.0).astype(jnp.bfloat16)
    h = jnp.dot(h, w2_ref[...], preferred_element_type=jnp.float32) + b2_ref[...]
    h = jnp.maximum(h, 0.0).astype(jnp.bfloat16)
    h = jnp.dot(h, w3_ref[...], preferred_element_type=jnp.float32) + b3_ref[...]
    o_ref[...] = h.astype(o_ref.dtype)


# ------------------------------- glue (XLA) -------------------------------- #

def _pool_phase_patches(x, kh, kw):
    """NHWC x -> (4, N*PH*PW, kh*kw*C) im2col stacked over the 4 pool phases."""
    N, H, W, C = x.shape
    OH, OW = H - kh + 1, W - kw + 1
    PH, PW = OH // 2, OW // 2
    phases = []
    for dy in (0, 1):
        for dx in (0, 1):
            taps = []
            for i in range(kh):
                for j in range(kw):
                    r0, c0 = dy + i, dx + j
                    v = x[:, r0:r0 + 2 * (PH - 1) + 1:2,
                          c0:c0 + 2 * (PW - 1) + 1:2, :]         # (N, PH, PW, C)
                    taps.append(v)
            a = jnp.stack(taps, axis=3)                          # (N, PH, PW, kh*kw, C)
            phases.append(a.reshape(N * PH * PW, kh * kw * C))
    return jnp.stack(phases, axis=0), PH, PW


def conv_relu_pool(x_nhwc, wmat, bvec, out_c):
    """Valid 5x5 conv (stride 1) + bias + ReLU + 2x2/2 maxpool, one pallas_call."""
    a, PH, PW = _pool_phase_patches(x_nhwc, 5, 5)
    _, M, K = a.shape
    Kp = wmat.shape[0]                         # K zero-padded to a multiple of 128
    m8 = _round_up(M, 8)
    TM = LANES if m8 >= LANES else m8          # 128, or the full 8-aligned row count
    Mp = _round_up(M, TM)
    a = jnp.pad(a, ((0, 0), (0, Mp - M), (0, Kp - K))).astype(jnp.bfloat16)

    flops = 2 * 4 * Mp * Kp * LANES
    bytes_acc = a.size * 2 + wmat.size * 2 + bvec.size * 4 + Mp * LANES * 2
    out = pl.pallas_call(
        _conv_pool_kernel,
        out_shape=jax.ShapeDtypeStruct((Mp, LANES), jnp.bfloat16),
        grid=(Mp // TM,),
        in_specs=[
            pl.BlockSpec((4, TM, Kp), lambda i: (0, i, 0)),
            pl.BlockSpec((Kp, LANES), lambda i: (0, 0)),
            pl.BlockSpec((1, LANES), lambda i: (0, 0)),
        ],
        out_specs=pl.BlockSpec((TM, LANES), lambda i: (i, 0)),
        compiler_params=pltpu.CompilerParams(dimension_semantics=("parallel",)),
        cost_estimate=pl.CostEstimate(flops=flops, transcendentals=0,
                                      bytes_accessed=bytes_acc),
    )(a, wmat, bvec)
    N = x_nhwc.shape[0]
    return out[:M, :out_c].reshape(N, PH, PW, out_c)


def fc_stack(x, pp):
    """Fused fc1/fc2/fc3 tail; x: (N, 400) ordered (h, w, c)."""
    N, K = x.shape
    Kp = pp["f1_w"].shape[0]                   # 512 (400 padded to lane multiple)
    n8 = _round_up(N, 8)
    TB = LANES if n8 >= LANES else n8
    Np = _round_up(N, TB)
    xp = jnp.pad(x, ((0, Np - N), (0, Kp - K))).astype(jnp.bfloat16)

    flops = 2 * Np * (Kp * LANES + LANES * LANES + LANES * LANES)
    bytes_acc = Np * Kp * 2 + (Kp * LANES + 2 * LANES * LANES) * 2 + Np * LANES * 4
    out = pl.pallas_call(
        _fc_stack_kernel,
        out_shape=jax.ShapeDtypeStruct((Np, LANES), jnp.float32),
        grid=(Np // TB,),
        in_specs=[
            pl.BlockSpec((TB, Kp), lambda i: (i, 0)),
            pl.BlockSpec((Kp, LANES), lambda i: (0, 0)),
            pl.BlockSpec((1, LANES), lambda i: (0, 0)),
            pl.BlockSpec((LANES, LANES), lambda i: (0, 0)),
            pl.BlockSpec((1, LANES), lambda i: (0, 0)),
            pl.BlockSpec((LANES, LANES), lambda i: (0, 0)),
            pl.BlockSpec((1, LANES), lambda i: (0, 0)),
        ],
        out_specs=pl.BlockSpec((TB, LANES), lambda i: (i, 0)),
        compiler_params=pltpu.CompilerParams(dimension_semantics=("parallel",)),
        cost_estimate=pl.CostEstimate(flops=flops, transcendentals=0,
                                      bytes_accessed=bytes_acc),
    )(xp, pp["f1_w"], pp["f1_b"], pp["f2_w"], pp["f2_b"], pp["f3_w"], pp["f3_b"])
    return out[:N, :10]


# --------------------------- params & preparation --------------------------- #

def init_params(key):
    ks = jax.random.split(key, 10)

    def u(k, fan_in, shape):   # torch default kaiming-uniform-ish bound
        bound = 1.0 / jnp.sqrt(jnp.float32(fan_in))
        return jax.random.uniform(k, shape, jnp.float32, -bound, bound)

    return {
        "conv1_w": u(ks[0], 3 * 5 * 5, (6, 3, 5, 5)),
        "conv1_b": u(ks[1], 3 * 5 * 5, (6,)),
        "conv2_w": u(ks[2], 6 * 5 * 5, (16, 6, 5, 5)),
        "conv2_b": u(ks[3], 6 * 5 * 5, (16,)),
        "fc1_w": u(ks[4], 400, (120, 400)),
        "fc1_b": u(ks[5], 400, (120,)),
        "fc2_w": u(ks[6], 120, (84, 120)),
        "fc2_b": u(ks[7], 120, (84,)),
        "fc3_w": u(ks[8], 84, (10, 84)),
        "fc3_b": u(ks[9], 84, (10,)),
    }


def _prep_conv(w, b):
    """torch (OC, C, kh, kw) -> (Kp, 128) bf16 + (1, 128) f32 bias."""
    oc, c, kh, kw = w.shape
    k = kh * kw * c
    kp = _round_up(k, LANES)
    wmat = jnp.transpose(w, (2, 3, 1, 0)).reshape(k, oc)   # rows ordered (kh,kw,c)
    wmat = jnp.pad(wmat, ((0, kp - k), (0, LANES - oc))).astype(jnp.bfloat16)
    bvec = jnp.pad(b, (0, LANES - oc)).reshape(1, LANES).astype(jnp.float32)
    return wmat, bvec


def _prep_fc(w, b, in_pad):
    """torch (out, in) -> (in_pad, 128) bf16 + (1, 128) f32 bias."""
    out_f, in_f = w.shape
    wt = jnp.pad(w.T, ((0, in_pad - in_f), (0, LANES - out_f))).astype(jnp.bfloat16)
    bp = jnp.pad(b, (0, LANES - out_f)).reshape(1, LANES).astype(jnp.float32)
    return wt, bp


def prepare_params(p):
    c1w, c1b = _prep_conv(p["conv1_w"], p["conv1_b"])
    c2w, c2b = _prep_conv(p["conv2_w"], p["conv2_b"])
    # fc1 columns reordered (c,h,w) -> (h,w,c) so the NHWC pooled activation
    # flattens with zero transposes in the forward pass.
    fc1_w = p["fc1_w"].reshape(120, 16, 5, 5).transpose(0, 2, 3, 1).reshape(120, 400)
    f1w, f1b = _prep_fc(fc1_w, p["fc1_b"], in_pad=_round_up(400, LANES))
    f2w, f2b = _prep_fc(p["fc2_w"], p["fc2_b"], in_pad=LANES)
    f3w, f3b = _prep_fc(p["fc3_w"], p["fc3_b"], in_pad=LANES)
    return {"c1_w": c1w, "c1_b": c1b, "c2_w": c2w, "c2_b": c2b,
            "f1_w": f1w, "f1_b": f1b, "f2_w": f2w, "f2_b": f2b,
            "f3_w": f3w, "f3_b": f3b}


# --------------------------------- forward ---------------------------------- #

def lenet_rgb_forward(pp, x_nchw):
    x = jnp.transpose(x_nchw, (0, 2, 3, 1))                    # NCHW -> NHWC, once
    h = conv_relu_pool(x, pp["c1_w"], pp["c1_b"], out_c=6)     # (N, 14, 14, 6) bf16
    h = conv_relu_pool(h, pp["c2_w"], pp["c2_b"], out_c=16)    # (N, 5, 5, 16) bf16
    h = h.reshape(h.shape[0], -1)                              # (N, 400), (h,w,c) order
    return fc_stack(h, pp)                                     # (N, 10) f32


if __name__ == "__main__":
    key = jax.random.PRNGKey(0)
    pkey, xkey = jax.random.split(key)
    params = init_params(pkey)
    prepped = prepare_params(params)          # transpose/pad/cast weights once
    # LeNetRGB geometry: 3-channel 32x32 input, NCHW like torch.
    x = jax.random.normal(xkey, (2, 3, 32, 32), dtype=jnp.float32)
    fwd = jax.jit(lenet_rgb_forward)
    out = jax.block_until_ready(fwd(prepped, x))
    assert out.shape == (2, 10) and out.dtype == jnp.float32
    print("KERNEL_OK")
</pallas_src>

<mosaic_0001>
module attributes {stable_mosaic.version = 11 : i64} {
  func.func @_conv_pool_kernel(%arg0: i32, %arg1: memref<4x128x128xbf16, #tpu.memory_space<vmem>>, %arg2: memref<128x128xbf16, #tpu.memory_space<vmem>>, %arg3: memref<1x128xf32, #tpu.memory_space<vmem>>, %arg4: memref<128x128xbf16, #tpu.memory_space<vmem>>) attributes {dimension_semantics = [#tpu.dimension_semantics<parallel>], iteration_bounds = array<i64: 4>, scalar_prefetch = 0 : i64, scratch_operands = 0 : i64, tpu.core_type = #tpu.core_type<tc>, window_params = [{transform_indices = @transform_0, window_bounds = array<i64: 4, 128, 128>}, {pipeline_mode = #tpu.pipeline_mode<synchronous>, transform_indices = @transform_1, window_bounds = array<i64: 128, 128>}, {pipeline_mode = #tpu.pipeline_mode<synchronous>, transform_indices = @transform_2, window_bounds = array<i64: 1, 128>}, {transform_indices = @transform_3, window_bounds = array<i64: 128, 128>}]} {
    %c0 = arith.constant 0 : index
    %c0_0 = arith.constant 0 : index
    %0 = vector.load %arg2[%c0, %c0_0] : memref<128x128xbf16, #tpu.memory_space<vmem>>, vector<128x128xbf16>
    %c0_1 = arith.constant 0 : index
    %c0_2 = arith.constant 0 : index
    %c0_3 = arith.constant 0 : index
    %1 = vector.load %arg1[%c0_1, %c0_2, %c0_3] : memref<4x128x128xbf16, #tpu.memory_space<vmem>>, vector<1x128x128xbf16>
    %2 = vector.shape_cast %1 : vector<1x128x128xbf16> to vector<128x128xbf16>
    %cst = arith.constant dense<0.000000e+00> : vector<128x128xf32>
    %3 = tpu.matmul %2, %0, %cst {dimension_numbers = #tpu.dot_dimension_numbers<[1], [0], [0], [1], [0, 0, 1, 1], [], []>} : vector<128x128xbf16>, vector<128x128xbf16>, vector<128x128xf32> -> vector<128x128xf32>
    %c1 = arith.constant 1 : index
    %c0_4 = arith.constant 0 : index
    %c0_5 = arith.constant 0 : index
    %4 = vector.load %arg1[%c1, %c0_4, %c0_5] : memref<4x128x128xbf16, #tpu.memory_space<vmem>>, vector<1x128x128xbf16>
    %5 = vector.shape_cast %4 : vector<1x128x128xbf16> to vector<128x128xbf16>
    %cst_6 = arith.constant dense<0.000000e+00> : vector<128x128xf32>
    %6 = tpu.matmul %5, %0, %cst_6 {dimension_numbers = #tpu.dot_dimension_numbers<[1], [0], [0], [1], [0, 0, 1, 1], [], []>} : vector<128x128xbf16>, vector<128x128xbf16>, vector<128x128xf32> -> vector<128x128xf32>
    %7 = arith.maximumf %3, %6 : vector<128x128xf32>
    %c2 = arith.constant 2 : index
    %c0_7 = arith.constant 0 : index
    %c0_8 = arith.constant 0 : index
    %8 = vector.load %arg1[%c2, %c0_7, %c0_8] : memref<4x128x128xbf16, #tpu.memory_space<vmem>>, vector<1x128x128xbf16>
    %9 = vector.shape_cast %8 : vector<1x128x128xbf16> to vector<128x128xbf16>
    %cst_9 = arith.constant dense<0.000000e+00> : vector<128x128xf32>
    %10 = tpu.matmul %9, %0, %cst_9 {dimension_numbers = #tpu.dot_dimension_numbers<[1], [0], [0], [1], [0, 0, 1, 1], [], []>} : vector<128x128xbf16>, vector<128x128xbf16>, vector<128x128xf32> -> vector<128x128xf32>
    %11 = arith.maximumf %7, %10 : vector<128x128xf32>
    %c3 = arith.constant 3 : index
    %c0_10 = arith.constant 0 : index
    %c0_11 = arith.constant 0 : index
    %12 = vector.load %arg1[%c3, %c0_10, %c0_11] : memref<4x128x128xbf16, #tpu.memory_space<vmem>>, vector<1x128x128xbf16>
    %13 = vector.shape_cast %12 : vector<1x128x128xbf16> to vector<128x128xbf16>
    %cst_12 = arith.constant dense<0.000000e+00> : vector<128x128xf32>
    %14 = tpu.matmul %13, %0, %cst_12 {dimension_numbers = #tpu.dot_dimension_numbers<[1], [0], [0], [1], [0, 0, 1, 1], [], []>} : vector<128x128xbf16>, vector<128x128xbf16>, vector<128x128xf32> -> vector<128x128xf32>
    %15 = arith.maximumf %11, %14 : vector<128x128xf32>
    %c0_13 = arith.constant 0 : index
    %c0_14 = arith.constant 0 : index
    %16 = vector.load %arg3[%c0_13, %c0_14] : memref<1x128xf32, #tpu.memory_space<vmem>>, vector<1x128xf32>
    %17 = vector.broadcast %16 : vector<1x128xf32> to vector<128x128xf32>
    %18 = arith.addf %15, %17 : vector<128x128xf32>
    %cst_15 = arith.constant 0.000000e+00 : f32
    %19 = vector.broadcast %cst_15 : f32 to vector<128x128xf32>
    %20 = arith.maximumf %18, %19 : vector<128x128xf32>
    %21 = arith.truncf %20 : vector<128x128xf32> to vector<128x128xbf16>
    %c0_16 = arith.constant 0 : index
    %c0_17 = arith.constant 0 : index
    %22 = vector.load %arg4[%c0_16, %c0_17] : memref<128x128xbf16, #tpu.memory_space<vmem>>, vector<128x128xbf16>
    tpu.vector_store %arg4[%c0_16, %c0_17], %21 {strides = array<i32>} : memref<128x128xbf16, #tpu.memory_space<vmem>>, vector<128x128xbf16>,
    return
  }
  func.func @transform_0(%arg0: i32) -> (i32, i32, i32) {
    %c0_i32 = arith.constant 0 : i32
    %c0_i32_0 = arith.constant 0 : i32
    %c0_i32_1 = arith.constant 0 : i32
    return %c0_i32, %arg0, %c0_i32_0 : i32, i32, i32
  }
  func.func @transform_1(%arg0: i32) -> (i32, i32) {
    %c0_i32 = arith.constant 0 : i32
    %c0_i32_0 = arith.constant 0 : i32
    %c0_i32_1 = arith.constant 0 : i32
    return %c0_i32, %c0_i32_0 : i32, i32
  }
  func.func @transform_2(%arg0: i32) -> (i32, i32) {
    %c0_i32 = arith.constant 0 : i32
    %c0_i32_0 = arith.constant 0 : i32
    %c0_i32_1 = arith.constant 0 : i32
    return %c0_i32, %c0_i32_0 : i32, i32
  }
  func.func @transform_3(%arg0: i32) -> (i32, i32) {
    %c0_i32 = arith.constant 0 : i32
    %c0_i32_0 = arith.constant 0 : i32
    return %arg0, %c0_i32 : i32, i32
  }
}

module attributes {stable_mosaic.version = 11 : i64} {
  func.func @_conv_pool_kernel(%arg0: i32, %arg1: memref<4x56x256xbf16, #tpu.memory_space<vmem>>, %arg2: memref<256x128xbf16, #tpu.memory_space<vmem>>, %arg3: memref<1x128xf32, #tpu.memory_space<vmem>>, %arg4: memref<56x128xbf16, #tpu.memory_space<vmem>>) attributes {dimension_semantics = [#tpu.dimension_semantics<parallel>], iteration_bounds = array<i64: 1>, scalar_prefetch = 0 : i64, scratch_operands = 0 : i64, tpu.core_type = #tpu.core_type<tc>, window_params = [{transform_indices = @transform_0, window_bounds = array<i64: 4, 56, 256>}, {pipeline_mode = #tpu.pipeline_mode<synchronous>, transform_indices = @transform_1, window_bounds = array<i64: 256, 128>}, {pipeline_mode = #tpu.pipeline_mode<synchronous>, transform_indices = @transform_2, window_bounds = array<i64: 1, 128>}, {transform_indices = @transform_3, window_bounds = array<i64: 56, 128>}]} {
    %c0 = arith.constant 0 : index
    %c0_0 = arith.constant 0 : index
    %0 = vector.load %arg2[%c0, %c0_0] : memref<256x128xbf16, #tpu.memory_space<vmem>>, vector<256x128xbf16>
    %c0_1 = arith.constant 0 : index
    %c0_2 = arith.constant 0 : index
    %c0_3 = arith.constant 0 : index
    %1 = vector.load %arg1[%c0_1, %c0_2, %c0_3] : memref<4x56x256xbf16, #tpu.memory_space<vmem>>, vector<1x56x256xbf16>
    %2 = vector.shape_cast %1 : vector<1x56x256xbf16> to vector<56x256xbf16>
    %cst = arith.constant dense<0.000000e+00> : vector<56x128xf32>
    %3 = tpu.matmul %2, %0, %cst {dimension_numbers = #tpu.dot_dimension_numbers<[1], [0], [0], [1], [0, 0, 1, 1], [], []>} : vector<56x256xbf16>, vector<256x128xbf16>, vector<56x128xf32> -> vector<56x128xf32>
    %c1 = arith.constant 1 : index
    %c0_4 = arith.constant 0 : index
    %c0_5 = arith.constant 0 : index
    %4 = vector.load %arg1[%c1, %c0_4, %c0_5] : memref<4x56x256xbf16, #tpu.memory_space<vmem>>, vector<1x56x256xbf16>
    %5 = vector.shape_cast %4 : vector<1x56x256xbf16> to vector<56x256xbf16>
    %cst_6 = arith.constant dense<0.000000e+00> : vector<56x128xf32>
    %6 = tpu.matmul %5, %0, %cst_6 {dimension_numbers = #tpu.dot_dimension_numbers<[1], [0], [0], [1], [0, 0, 1, 1], [], []>} : vector<56x256xbf16>, vector<256x128xbf16>, vector<56x128xf32> -> vector<56x128xf32>
    %7 = arith.maximumf %3, %6 : vector<56x128xf32>
    %c2 = arith.constant 2 : index
    %c0_7 = arith.constant 0 : index
    %c0_8 = arith.constant 0 : index
    %8 = vector.load %arg1[%c2, %c0_7, %c0_8] : memref<4x56x256xbf16, #tpu.memory_space<vmem>>, vector<1x56x256xbf16>
    %9 = vector.shape_cast %8 : vector<1x56x256xbf16> to vector<56x256xbf16>
    %cst_9 = arith.constant dense<0.000000e+00> : vector<56x128xf32>
    %10 = tpu.matmul %9, %0, %cst_9 {dimension_numbers = #tpu.dot_dimension_numbers<[1], [0], [0], [1], [0, 0, 1, 1], [], []>} : vector<56x256xbf16>, vector<256x128xbf16>, vector<56x128xf32> -> vector<56x128xf32>
    %11 = arith.maximumf %7, %10 : vector<56x128xf32>
    %c3 = arith.constant 3 : index
    %c0_10 = arith.constant 0 : index
    %c0_11 = arith.constant 0 : index
    %12 = vector.load %arg1[%c3, %c0_10, %c0_11] : memref<4x56x256xbf16, #tpu.memory_space<vmem>>, vector<1x56x256xbf16>
    %13 = vector.shape_cast %12 : vector<1x56x256xbf16> to vector<56x256xbf16>
    %cst_12 = arith.constant dense<0.000000e+00> : vector<56x128xf32>
    %14 = tpu.matmul %13, %0, %cst_12 {dimension_numbers = #tpu.dot_dimension_numbers<[1], [0], [0], [1], [0, 0, 1, 1], [], []>} : vector<56x256xbf16>, vector<256x128xbf16>, vector<56x128xf32> -> vector<56x128xf32>
    %15 = arith.maximumf %11, %14 : vector<56x128xf32>
    %c0_13 = arith.constant 0 : index
    %c0_14 = arith.constant 0 : index
    %16 = vector.load %arg3[%c0_13, %c0_14] : memref<1x128xf32, #tpu.memory_space<vmem>>, vector<1x128xf32>
    %17 = vector.broadcast %16 : vector<1x128xf32> to vector<56x128xf32>
    %18 = arith.addf %15, %17 : vector<56x128xf32>
    %cst_15 = arith.constant 0.000000e+00 : f32
    %19 = vector.broadcast %cst_15 : f32 to vector<56x128xf32>
    %20 = arith.maximumf %18, %19 : vector<56x128xf32>
    %21 = arith.truncf %20 : vector<56x128xf32> to vector<56x128xbf16>
    %c0_16 = arith.constant 0 : index
    %c0_17 = arith.constant 0 : index
    %22 = vector.load %arg4[%c0_16, %c0_17] : memref<56x128xbf16, #tpu.memory_space<vmem>>, vector<56x128xbf16>
    tpu.vector_store %arg4[%c0_16, %c0_17], %21 {strides = array<i32>} : memref<56x128xbf16, #tpu.memory_space<vmem>>, vector<56x128xbf16>,
    return
  }
  func.func @transform_0(%arg0: i32) -> (i32, i32, i32) {
    %c0_i32 = arith.constant 0 : i32
    %c0_i32_0 = arith.constant 0 : i32
    %c0_i32_1 = arith.constant 0 : i32
    return %c0_i32, %arg0, %c0_i32_0 : i32, i32, i32
  }
  func.func @transform_1(%arg0: i32) -> (i32, i32) {
    %c0_i32 = arith.constant 0 : i32
    %c0_i32_0 = arith.constant 0 : i32
    %c0_i32_1 = arith.constant 0 : i32
    return %c0_i32, %c0_i32_0 : i32, i32
  }
  func.func @transform_2(%arg0: i32) -> (i32, i32) {
    %c0_i32 = arith.constant 0 : i32
    %c0_i32_0 = arith.constant 0 : i32
    %c0_i32_1 = arith.constant 0 : i32
    return %c0_i32, %c0_i32_0 : i32, i32
  }
  func.func @transform_3(%arg0: i32) -> (i32, i32) {
    %c0_i32 = arith.constant 0 : i32
    %c0_i32_0 = arith.constant 0 : i32
    return %arg0, %c0_i32 : i32, i32
  }
}

module attributes {stable_mosaic.version = 11 : i64} {
  func.func @_fc_stack_kernel(%arg0: i32, %arg1: memref<8x512xbf16, #tpu.memory_space<vmem>>, %arg2: memref<512x128xbf16, #tpu.memory_space<vmem>>, %arg3: memref<1x128xf32, #tpu.memory_space<vmem>>, %arg4: memref<128x128xbf16, #tpu.memory_space<vmem>>, %arg5: memref<1x128xf32, #tpu.memory_space<vmem>>, %arg6: memref<128x128xbf16, #tpu.memory_space<vmem>>, %arg7: memref<1x128xf32, #tpu.memory_space<vmem>>, %arg8: memref<8x128xf32, #tpu.memory_space<vmem>>) attributes {dimension_semantics = [#tpu.dimension_semantics<parallel>], iteration_bounds = array<i64: 1>, scalar_prefetch = 0 : i64, scratch_operands = 0 : i64, tpu.core_type = #tpu.core_type<tc>, window_params = [{transform_indices = @transform_0, window_bounds = array<i64: 8, 512>}, {pipeline_mode = #tpu.pipeline_mode<synchronous>, transform_indices = @transform_1, window_bounds = array<i64: 512, 128>}, {pipeline_mode = #tpu.pipeline_mode<synchronous>, transform_indices = @transform_2, window_bounds = array<i64: 1, 128>}, {pipeline_mode = #tpu.pipeline_mode<synchronous>, transform_indices = @transform_3, window_bounds = array<i64: 128, 128>}, {pipeline_mode = #tpu.pipeline_mode<synchronous>, transform_indices = @transform_4, window_bounds = array<i64: 1, 128>}, {pipeline_mode = #tpu.pipeline_mode<synchronous>, transform_indices = @transform_5, window_bounds = array<i64: 128, 128>}, {pipeline_mode = #tpu.pipeline_mode<synchronous>, transform_indices = @transform_6, window_bounds = array<i64: 1, 128>}, {transform_indices = @transform_7, window_bounds = array<i64: 8, 128>}]} {
    %c0 = arith.constant 0 : index
    %c0_0 = arith.constant 0 : index
    %0 = vector.load %arg1[%c0, %c0_0] : memref<8x512xbf16, #tpu.memory_space<vmem>>, vector<8x512xbf16>
    %c0_1 = arith.constant 0 : index
    %c0_2 = arith.constant 0 : index
    %1 = vector.load %arg2[%c0_1, %c0_2] : memref<512x128xbf16, #tpu.memory_space<vmem>>, vector<512x128xbf16>
    %cst = arith.constant dense<0.000000e+00> : vector<8x128xf32>
    %2 = tpu.matmul %0, %1, %cst {dimension_numbers = #tpu.dot_dimension_numbers<[1], [0], [0], [1], [0, 0, 1, 1], [], []>} : vector<8x512xbf16>, vector<512x128xbf16>, vector<8x128xf32> -> vector<8x128xf32>
    %c0_3 = arith.constant 0 : index
    %c0_4 = arith.constant 0 : index
    %3 = vector.load %arg3[%c0_3, %c0_4] : memref<1x128xf32, #tpu.memory_space<vmem>>, vector<1x128xf32>
    %4 = vector.broadcast %3 : vector<1x128xf32> to vector<8x128xf32>
    %5 = arith.addf %2, %4 : vector<8x128xf32>
    %cst_5 = arith.constant 0.000000e+00 : f32
    %6 = vector.broadcast %cst_5 : f32 to vector<8x128xf32>
    %7 = arith.maximumf %5, %6 : vector<8x128xf32>
    %8 = arith.truncf %7 : vector<8x128xf32> to vector<8x128xbf16>
    %c0_6 = arith.constant 0 : index
    %c0_7 = arith.constant 0 : index
    %9 = vector.load %arg4[%c0_6, %c0_7] : memref<128x128xbf16, #tpu.memory_space<vmem>>, vector<128x128xbf16>
    %cst_8 = arith.constant dense<0.000000e+00> : vector<8x128xf32>
    %10 = tpu.matmul %8, %9, %cst_8 {dimension_numbers = #tpu.dot_dimension_numbers<[1], [0], [0], [1], [0, 0, 1, 1], [], []>} : vector<8x128xbf16>, vector<128x128xbf16>, vector<8x128xf32> -> vector<8x128xf32>
    %c0_9 = arith.constant 0 : index
    %c0_10 = arith.constant 0 : index
    %11 = vector.load %arg5[%c0_9, %c0_10] : memref<1x128xf32, #tpu.memory_space<vmem>>, vector<1x128xf32>
    %12 = vector.broadcast %11 : vector<1x128xf32> to vector<8x128xf32>
    %13 = arith.addf %10, %12 : vector<8x128xf32>
    %cst_11 = arith.constant 0.000000e+00 : f32
    %14 = vector.broadcast %cst_11 : f32 to vector<8x128xf32>
    %15 = arith.maximumf %13, %14 : vector<8x128xf32>
    %16 = arith.truncf %15 : vector<8x128xf32> to vector<8x128xbf16>
    %c0_12 = arith.constant 0 : index
    %c0_13 = arith.constant 0 : index
    %17 = vector.load %arg6[%c0_12, %c0_13] : memref<128x128xbf16, #tpu.memory_space<vmem>>, vector<128x128xbf16>
    %cst_14 = arith.constant dense<0.000000e+00> : vector<8x128xf32>
    %18 = tpu.matmul %16, %17, %cst_14 {dimension_numbers = #tpu.dot_dimension_numbers<[1], [0], [0], [1], [0, 0, 1, 1], [], []>} : vector<8x128xbf16>, vector<128x128xbf16>, vector<8x128xf32> -> vector<8x128xf32>
    %c0_15 = arith.constant 0 : index
    %c0_16 = arith.constant 0 : index
    %19 = vector.load %arg7[%c0_15, %c0_16] : memref<1x128xf32, #tpu.memory_space<vmem>>, vector<1x128xf32>
    %20 = vector.broadcast %19 : vector<1x128xf32> to vector<8x128xf32>
    %21 = arith.addf %18, %20 : vector<8x128xf32>
    %c0_17 = arith.constant 0 : index
    %c0_18 = arith.constant 0 : index
    %22 = vector.load %arg8[%c0_17, %c0_18] : memref<8x128xf32, #tpu.memory_space<vmem>>, vector<8x128xf32>
    tpu.vector_store %arg8[%c0_17, %c0_18], %21 {strides = array<i32>} : memref<8x128xf32, #tpu.memory_space<vmem>>, vector<8x128xf32>,
    return
  }
  func.func @transform_0(%arg0: i32) -> (i32, i32) {
    %c0_i32 = arith.constant 0 : i32
    %c0_i32_0 = arith.constant 0 : i32
    return %arg0, %c0_i32 : i32, i32
  }
  func.func @transform_1(%arg0: i32) -> (i32, i32) {
    %c0_i32 = arith.constant 0 : i32
    %c0_i32_0 = arith.constant 0 : i32
    %c0_i32_1 = arith.constant 0 : i32
    return %c0_i32, %c0_i32_0 : i32, i32
  }
  func.func @transform_2(%arg0: i32) -> (i32, i32) {
    %c0_i32 = arith.constant 0 : i32
    %c0_i32_0 = arith.constant 0 : i32
    %c0_i32_1 = arith.constant 0 : i32
    return %c0_i32, %c0_i32_0 : i32, i32
  }
  func.func @transform_3(%arg0: i32) -> (i32, i32) {
    %c0_i32 = arith.constant 0 : i32
    %c0_i32_0 = arith.constant 0 : i32
    %c0_i32_1 = arith.constant 0 : i32
    return %c0_i32, %c0_i32_0 : i32, i32
  }
  func.func @transform_4(%arg0: i32) -> (i32, i32) {
    %c0_i32 = arith.constant 0 : i32
    %c0_i32_0 = arith.constant 0 : i32
    %c0_i32_1 = arith.constant 0 : i32
    return %c0_i32, %c0_i32_0 : i32, i32
  }
  func.func @transform_5(%arg0: i32) -> (i32, i32) {
    %c0_i32 = arith.constant 0 : i32
    %c0_i32_0 = arith.constant 0 : i32
    %c0_i32_1 = arith.constant 0 : i32
    return %c0_i32, %c0_i32_0 : i32, i32
  }
  func.func @transform_6(%arg0: i32) -> (i32, i32) {
    %c0_i32 = arith.constant 0 : i32
    %c0_i32_0 = arith.constant 0 : i32
    %c0_i32_1 = arith.constant 0 : i32
    return %c0_i32, %c0_i32_0 : i32, i32
  }
  func.func @transform_7(%arg0: i32) -> (i32, i32) {
    %c0_i32 = arith.constant 0 : i32
    %c0_i32_0 = arith.constant 0 : i32
    return %arg0, %c0_i32 : i32, i32
  }
}

</mosaic_0001>

<bundles_post_ra>
// kernel: lenet_rgb_forward.3
= control target key start
LH: loop header
LB: loop body
LE: loop exit
PB: predicated region body
PF: predicated region fallthrough
CT: control target
= control target key end

     0   :  { %s1892_s12 = smov 0   ;;  %s1894_s13 = smov 0   ;;  %s2211_s0 = inlined_call_operand.vmem [shape: bf16[4,512,128], index: 0, kind: input, shape index: {}]   ;;  %s2212_s1 = inlined_call_operand.vmem [shape: bf16[128,128], index: 1, kind: input, shape index: {}]   ;;  %s2213_s2 = inlined_call_operand.vmem [shape: f32[1,128], index: 2, kind: input, shape index: {}]   ;;  %s2214_s3 = inlined_call_operand.vmem [shape: bf16[512,128], index: 3, kind: output, shape index: {}]  }
   0x1   :  { %s1896_s14 = smov 0  }
   0x2 LB: > { %s1410_s15 = sadd.s32 4294967295, %s1870_s14   ;;  %s1909_s16 = sadd.s32 1, %s1870_s14   ;;  %s1870_s14 = sphi %s1896_s14, %s2217_s14   ;;  %s1866_s13 = sphi %s1894_s13, %s2216_s13   ;;  %s1862_s12 = sphi %s1892_s12, %s2215_s12  }
   0x3   : > { %s17_s17 = ssub.s32 %s1870_s14, %s1909_s16  ;;  %s20_s18 = sadd.s32 1, %s1866_s13 }
   0x4   : > { %p18_p0 = scmp.eq.s32.totalorder %s17_s17, 0  ;;  %p27_p1 = scmp.ne.s32.totalorder %s1866_s13, %s1862_s12 }
   0x5   : > { %p28_p2 = scmp.eq.s32.totalorder %s1870_s14, 0  ;;  %p1413_p4 = scmp.ge.s32.totalorder %s1870_s14, 4 }
   0x6   : > { %s1918_s19 = scalar_select %p18_p0, %s1866_s13, %s20_s18  }
   0x7   : > { %p29_p3 = por %p28_p2, %p27_p1  ;;  %127 = sbr.rel (%p1413_p4) target bundleno = 32 (0x20), region = 24 }
   0xc   : > { %130 = sbr.rel (!%p29_p3) target bundleno = 32 (0x20), region = 28  ;;  %s132_s20 = sand.u32 (%p29_p3), 1, %s1866_s13  }
   0xd   : > { %s1528_s21 = sshll.u32 (%p29_p3), %s1870_s14, 6  ;;  %s1414_s22 = sshll.u32 (%p29_p3), %s132_s20, 8 }
   0xe   : > { %s1926_s25 = scalar_lea.vmem (%p29_p3), %s2211_s0, %s1528_s21  ;;  %s1931_s26 = scalar_lea.vmem (%p29_p3), [#allocation2], %s1414_s22 }
   0xf   : > { %v154_v0 = vld [vmem:[%s1926_s25] sm:$0xff] (%p29_p3)   ;;  %v158_v1 = vld [vmem:[%s1926_s25 + $0x8] sm:$0xff] (%p29_p3)   ;;  %v162_v2 = vld [vmem:[%s1926_s25 + $0x10] sm:$0xff] (%p29_p3)  }
  0x10   : > { %155 = vst [vmem:[%s1931_s26] sm:$0xff] (%p29_p3), %v154_v0   ;;  %159 = vst [vmem:[%s1931_s26 + $0x8] sm:$0xff] (%p29_p3), %v158_v1   ;;  %v166_v3 = vld [vmem:[%s1926_s25 + $0x18] sm:$0xff] (%p29_p3)   ;;  %v170_v4 = vld [vmem:[%s1926_s25 + $0x20] sm:$0xff] (%p29_p3)  }
  0x11   : > { %163 = vst [vmem:[%s1931_s26 + $0x10] sm:$0xff] %v162_v2   ;;  %v174_v5 = vld [vmem:[%s1926_s25 + $0x28] sm:$0xff]   ;;  %167 = vst [vmem:[%s1931_s26 + $0x18] sm:$0xff] %v166_v3   ;;  %v178_v6 = vld [vmem:[%s1926_s25 + $0x30] sm:$0xff]  }
  0x12   : > { %171 = vst [vmem:[%s1931_s26 + $0x20] sm:$0xff] %v170_v4   ;;  %175 = vst [vmem:[%s1931_s26 + $0x28] sm:$0xff] %v174_v5   ;;  %v182_v7 = vld [vmem:[%s1926_s25 + $0x38] sm:$0xff]   ;;  %v186_v8 = vld [vmem:[%s1926_s25 + $0x100] sm:$0xff]  }
  0x13   : > { %179 = vst [vmem:[%s1931_s26 + $0x30] sm:$0xff] %v178_v6   ;;  %183 = vst [vmem:[%s1931_s26 + $0x38] sm:$0xff] %v182_v7   ;;  %v190_v9 = vld [vmem:[%s1926_s25 + $0x108] sm:$0xff]   ;;  %v194_v10 = vld [vmem:[%s1926_s25 + $0x110] sm:$0xff]  }
  0x14   : > { %187 = vst [vmem:[%s1931_s26 + $0x40] sm:$0xff] %v186_v8   ;;  %v198_v11 = vld [vmem:[%s1926_s25 + $0x118] sm:$0xff]   ;;  %191 = vst [vmem:[%s1931_s26 + $0x48] sm:$0xff] %v190_v9   ;;  %v202_v12 = vld [vmem:[%s1926_s25 + $0x120] sm:$0xff]  }
  0x15   : > { %195 = vst [vmem:[%s1931_s26 + $0x50] sm:$0xff] %v194_v10   ;;  %199 = vst [vmem:[%s1931_s26 + $0x58] sm:$0xff] %v198_v11   ;;  %v206_v13 = vld [vmem:[%s1926_s25 + $0x128] sm:$0xff]   ;;  %v210_v14 = vld [vmem:[%s1926_s25 + $0x130] sm:$0xff]  }
  0x16   : > { %203 = vst [vmem:[%s1931_s26 + $0x60] sm:$0xff] %v202_v12   ;;  %207 = vst [vmem:[%s1931_s26 + $0x68] sm:$0xff] %v206_v13   ;;  %v214_v15 = vld [vmem:[%s1926_s25 + $0x138] sm:$0xff]   ;;  %v218_v16 = vld [vmem:[%s1926_s25 + $0x200] sm:$0xff]  }
  0x17   : > { %211 = vst [vmem:[%s1931_s26 + $0x70] sm:$0xff] %v210_v14   ;;  %v222_v17 = vld [vmem:[%s1926_s25 + $0x208] sm:$0xff]   ;;  %215 = vst [vmem:[%s1931_s26 + $0x78] sm:$0xff] %v214_v15   ;;  %v226_v18 = vld [vmem:[%s1926_s25 + $0x210] sm:$0xff]  }
  0x18   : > { %219 = vst [vmem:[%s1931_s26 + $0x80] sm:$0xff] %v218_v16   ;;  %223 = vst [vmem:[%s1931_s26 + $0x88] sm:$0xff] %v222_v17   ;;  %v230_v19 = vld [vmem:[%s1926_s25 + $0x218] sm:$0xff]   ;;  %v234_v20 = vld [vmem:[%s1926_s25 + $0x220] sm:$0xff]  }
  0x19   : > { %227 = vst [vmem:[%s1931_s26 + $0x90] sm:$0xff] %v226_v18   ;;  %231 = vst [vmem:[%s1931_s26 + $0x98] sm:$0xff] %v230_v19   ;;  %v238_v21 = vld [vmem:[%s1926_s25 + $0x228] sm:$0xff]   ;;  %v242_v22 = vld [vmem:[%s1926_s25 + $0x230] sm:$0xff]  }
  0x1a   : > { %235 = vst [vmem:[%s1931_s26 + $0xa0] sm:$0xff] %v234_v20   ;;  %v246_v23 = vld [vmem:[%s1926_s25 + $0x238] sm:$0xff]   ;;  %239 = vst [vmem:[%s1931_s26 + $0xa8] sm:$0xff] %v238_v21   ;;  %v250_v24 = vld [vmem:[%s1926_s25 + $0x300] sm:$0xff]  }
  0x1b   : > { %243 = vst [vmem:[%s1931_s26 + $0xb0] sm:$0xff] %v242_v22   ;;  %247 = vst [vmem:[%s1931_s26 + $0xb8] sm:$0xff] %v246_v23   ;;  %v254_v25 = vld [vmem:[%s1926_s25 + $0x308] sm:$0xff]   ;;  %v258_v26 = vld [vmem:[%s1926_s25 + $0x310] sm:$0xff]  }
  0x1c   : > { %251 = vst [vmem:[%s1931_s26 + $0xc0] sm:$0xff] %v250_v24   ;;  %255 = vst [vmem:[%s1931_s26 + $0xc8] sm:$0xff] %v254_v25   ;;  %v262_v27 = vld [vmem:[%s1926_s25 + $0x318] sm:$0xff]   ;;  %v266_v28 = vld [vmem:[%s1926_s25 + $0x320] sm:$0xff]  }
  0x1d   : > { %259 = vst [vmem:[%s1931_s26 + $0xd0] sm:$0xff] %v258_v26   ;;  %v270_v29 = vld [vmem:[%s1926_s25 + $0x328] sm:$0xff]   ;;  %263 = vst [vmem:[%s1931_s26 + $0xd8] sm:$0xff] %v262_v27   ;;  %v274_v30 = vld [vmem:[%s1926_s25 + $0x330] sm:$0xff]  }
  0x1e   : > { %267 = vst [vmem:[%s1931_s26 + $0xe0] sm:$0xff] %v266_v28   ;;  %271 = vst [vmem:[%s1931_s26 + $0xe8] sm:$0xff] %v270_v29   ;;  %v278_v31 = vld [vmem:[%s1926_s25 + $0x338] sm:$0xff]  }
  0x1f   : > { %275 = vst [vmem:[%s1931_s26 + $0xf0] sm:$0xff] %v274_v30   ;;  %279 = vst [vmem:[%s1931_s26 + $0xf8] sm:$0xff] %v278_v31  }
  0x20 PF: > { %p1417_p5 = scmp.ge.s32.totalorder %s1870_s14, 1  ;;  %p432_p6 = scmp.lt.s32.totalorder %s1870_s14, 5 }
  0x22   : > { %p433_p7 = pnand %p1417_p5, %p432_p6 }
  0x23   : > { %s439_s29 = sand.u32 (!%p433_p7), 1, %s1862_s12   ;;  %s1419_s24 = sshll.u32 (!%p433_p7), %s1410_s15, 4 }
  0x24   : > { %436 = sbr.rel (%p433_p7) target bundleno = 340 (0x154), region = 69  ;;  %s1418_s5 = sshll.u32 (!%p433_p7), %s439_s29, 8 }
  0x25   : > { %s2011_s10 = scalar_lea.vmem (!%p433_p7), [#allocation2], %s1418_s5  ;;  %p464_p8 = scmp.lt.s32.totalorder (!%p433_p7), %s1419_s24, 63 }
  0x29   : > { %v1808_v32 = vld [vmem:[%s2212_s1 + $0x38] sm:$0xff]   ;;  %v1809_v33 = vld [vmem:[%s2212_s1 + $0x30] sm:$0xff]   ;;  %v1810_v34 = vld [vmem:[%s2212_s1 + $0x28] sm:$0xff]   ;;  %s2219_s24 = smov (!%p464_p8, %s1419_s24), 63 }
  0x2a   : > { %1656 = vmatprep.subr.bf16.mxu0 %v1808_v32  ;;  %1688 = vmatprep.subr.bf16.mxu1 %v1808_v32  ;;  %v2009_v35 = vld [vmem:[%s2212_s1 + $0x20] sm:$0xff]   ;;  %v2020_v38 = vld [vmem:[%s2212_s1 + $0x18] sm:$0xff]   ;;  %v2029_v39 = vld [vmem:[%s2212_s1 + $0x10] sm:$0xff]   ;;  %s1420_s14 = sshll.u32 %s2219_s24, 2 }
  0x2b   : > { %1657 = vmatpush3.bf16.msra.mxu0 %v1808_v32  ;;  %1689 = vmatpush3.bf16.msra.mxu1 %v1808_v32  ;;  %v1816_v36 = vld [vmem:[%s2011_s10] sm:$0xff]   ;;  %v2038_v40 = vld [vmem:[%s2212_s1 + $0x8] sm:$0xff]   ;;  %v1820_v44 = vld [vmem:[%s2011_s10 + $0x10] sm:$0xff]   ;;  %s2163_s28 = scalar_lea.vmem %s2214_s3, %s1420_s14 }
  0x2c   : > { %1658 = vmatprep.subr.bf16.mxu0 %v1809_v33  ;;  %1690 = vmatprep.subr.bf16.mxu1 %v1809_v33  ;;  %v1817_v37 = vld [vmem:[%s2011_s10 + $0x40] sm:$0xff]   ;;  %v1818_v42 = vld [vmem:[%s2011_s10 + $0x8] sm:$0xff]   ;;  %v1821_v45 = vld [vmem:[%s2011_s10 + $0x50] sm:$0xff]  }
  0x2d   : > { %1672 = vmatprep.mubr.bf16.mxu0 %v1816_v36  ;;  %1704 = vmatprep.mubr.bf16.mxu1 %v1817_v37  ;;  %v2047_v41 = vld [vmem:[%s2212_s1] sm:$0xff]   ;;  %v1819_v43 = vld [vmem:[%s2011_s10 + $0x48] sm:$0xff]   ;;  %v1822_v46 = vld [vmem:[%s2011_s10 + $0x18] sm:$0xff]  }
  0x2e   : > { %v1823_v47 = vld [vmem:[%s2011_s10 + $0x58] sm:$0xff]   ;;  %v1824_v48 = vld [vmem:[%s2011_s10 + $0x20] sm:$0xff]   ;;  %v1826_v50 = vld [vmem:[%s2011_s10 + $0x28] sm:$0xff]  }
  0x2f   : > { %1659 = vmatpush3.bf16.msra.mxu0 %v1809_v33  ;;  %1691 = vmatpush3.bf16.msra.mxu1 %v1809_v33  ;;  %v1825_v49 = vld [vmem:[%s2011_s10 + $0x60] sm:$0xff]   ;;  %v1827_v51 = vld [vmem:[%s2011_s10 + $0x68] sm:$0xff]   ;;  %v1828_v52 = vld [vmem:[%s2011_s10 + $0x30] sm:$0xff]  }
  0x30   : > { %1660 = vmatprep.subr.bf16.mxu0 %v1810_v34  ;;  %1692 = vmatprep.subr.bf16.mxu1 %v1810_v34  ;;  %v1829_v53 = vld [vmem:[%s2011_s10 + $0x70] sm:$0xff]   ;;  %v1830_v54 = vld [vmem:[%s2011_s10 + $0x38] sm:$0xff]   ;;  %v1832_v56 = vld [vmem:[%s2011_s10 + $0x80] sm:$0xff]  }
  0x31   : > { %v1831_v55 = vld [vmem:[%s2011_s10 + $0x78] sm:$0xff]   ;;  %v1833_v57 = vld [vmem:[%s2011_s10 + $0xc0] sm:$0xff]   ;;  %v1834_v58 = vld [vmem:[%s2011_s10 + $0x88] sm:$0xff]  }
  0x32   : > { %v1835_v59 = vld [vmem:[%s2011_s10 + $0xc8] sm:$0xff]   ;;  %v1836_v60 = vld [vmem:[%s2011_s10 + $0x90] sm:$0xff]   ;;  %v1838_v62 = vld [vmem:[%s2011_s10 + $0x98] sm:$0xff]  }
  0x33   : > { %1661 = vmatpush3.bf16.msra.mxu0 %v1810_v34  ;;  %1693 = vmatpush3.bf16.msra.mxu1 %v1810_v34  ;;  %v1837_v61 = vld [vmem:[%s2011_s10 + $0xd0] sm:$0xff]   ;;  %v1839_v63 = vld [vmem:[%s2011_s10 + $0xd8] sm:$0xff]   ;;  %v1840_v0 = vld [vmem:[%s2011_s10 + $0xa0] sm:$0xff]  }
  0x34   : > { %1662 = vmatprep.subr.bf16.mxu0 %v2009_v35  ;;  %1694 = vmatprep.subr.bf16.mxu1 %v2009_v35  ;;  %v1841_v1 = vld [vmem:[%s2011_s10 + $0xe0] sm:$0xff]   ;;  %v1842_v2 = vld [vmem:[%s2011_s10 + $0xa8] sm:$0xff]   ;;  %v1844_v4 = vld [vmem:[%s2011_s10 + $0xb0] sm:$0xff]  }
  0x35   : > { %v1843_v3 = vld [vmem:[%s2011_s10 + $0xe8] sm:$0xff]   ;;  %v1845_v5 = vld [vmem:[%s2011_s10 + $0xf0] sm:$0xff]   ;;  %v1846_v6 = vld [vmem:[%s2011_s10 + $0xb8] sm:$0xff]  }
  0x36   : > { %v1847_v7 = vld [vmem:[%s2011_s10 + $0xf8] sm:$0xff]  }
  0x37   : > { %1663 = vmatpush3.bf16.msra.mxu0 %v2009_v35  ;;  %1695 = vmatpush3.bf16.msra.mxu1 %v2009_v35 }
  0x38   : > { %1664 = vmatprep.subr.bf16.mxu0 %v2020_v38  ;;  %1696 = vmatprep.subr.bf16.mxu1 %v2020_v38 }
  0x3b   : > { %1665 = vmatpush3.bf16.msra.mxu0 %v2020_v38  ;;  %1697 = vmatpush3.bf16.msra.mxu1 %v2020_v38 }
  0x3c   : > { %1666 = vmatprep.subr.bf16.mxu0 %v2029_v39  ;;  %1698 = vmatprep.subr.bf16.mxu1 %v2029_v39 }
  0x3f   : > { %1667 = vmatpush3.bf16.msra.mxu0 %v2029_v39  ;;  %1699 = vmatpush3.bf16.msra.mxu1 %v2029_v39 }
  0x40   : > { %1668 = vmatprep.subr.bf16.mxu0 %v2038_v40  ;;  %1700 = vmatprep.subr.bf16.mxu1 %v2038_v40 }
  0x43   : > { %1669 = vmatpush3.bf16.msra.mxu0 %v2038_v40  ;;  %1701 = vmatpush3.bf16.msra.mxu1 %v2038_v40 }
  0x44   : > { %1670 = vmatprep.subr.bf16.mxu0 %v2047_v41  ;;  %1702 = vmatprep.subr.bf16.mxu1 %v2047_v41 }
  0x47   : > { %1671 = vmatpush3.bf16.msra.mxu0 %v2047_v41  ;;  %1703 = vmatpush3.bf16.msra.mxu1 %v2047_v41 }
  0x48   : > { %1720 = vmatprep.subr.bf16.mxu0 %v1808_v32  ;;  %1752 = vmatprep.subr.bf16.mxu1 %v1808_v32 }
  0x4a   : > { %1673 = vmatmul.mubr.bf16.vlgmr.msra.gmra.mxu0 %v1818_v42  ;;  %1705 = vmatmul.mubr.bf16.vlgmr.msra.gmra.mxu1 %v1819_v43 }
  0x4b   : > { %1721 = vmatpush3.bf16.msra.mxu0 %v1808_v32  ;;  %1753 = vmatpush3.bf16.msra.mxu1 %v1808_v32 }
  0x4c   : > { %1722 = vmatprep.subr.bf16.mxu0 %v1809_v33  ;;  %1754 = vmatprep.subr.bf16.mxu1 %v1809_v33 }
  0x4d   : > { %1676 = vmatprep.mubr.bf16.mxu0 %v1820_v44  ;;  %1708 = vmatprep.mubr.bf16.mxu1 %v1821_v45 }
  0x4f   : > { %1723 = vmatpush3.bf16.msra.mxu0 %v1809_v33  ;;  %1755 = vmatpush3.bf16.msra.mxu1 %v1809_v33 }
  0x50   : > { %1724 = vmatprep.subr.bf16.mxu0 %v1810_v34  ;;  %1756 = vmatprep.subr.bf16.mxu1 %v1810_v34 }
  0x52   : > { %1677 = vmatmul.mubr.bf16.gmra.mxu0 %v1822_v46  ;;  %1709 = vmatmul.mubr.bf16.gmra.mxu1 %v1823_v47 }
  0x53   : > { %1725 = vmatpush3.bf16.msra.mxu0 %v1810_v34  ;;  %1757 = vmatpush3.bf16.msra.mxu1 %v1810_v34 }
  0x54   : > { %1726 = vmatprep.subr.bf16.mxu0 %v2009_v35  ;;  %1758 = vmatprep.subr.bf16.mxu1 %v2009_v35 }
  0x55   : > { %1680 = vmatprep.mubr.bf16.mxu0 %v1824_v48  ;;  %1712 = vmatprep.mubr.bf16.mxu1 %v1825_v49 }
  0x57   : > { %1727 = vmatpush3.bf16.msra.mxu0 %v2009_v35  ;;  %1759 = vmatpush3.bf16.msra.mxu1 %v2009_v35 }
  0x58   : > { %1728 = vmatprep.subr.bf16.mxu0 %v2020_v38  ;;  %1760 = vmatprep.subr.bf16.mxu1 %v2020_v38 }
  0x5a   : > { %1681 = vmatmul.mubr.bf16.gmra.mxu0 %v1826_v50  ;;  %1713 = vmatmul.mubr.bf16.gmra.mxu1 %v1827_v51  ;;  %v2150_v50 = vld [vmem:[%s2213_s2] ss:$0 sm:$0xff] }
  0x5b   : > { %1729 = vmatpush3.bf16.msra.mxu0 %v2020_v38  ;;  %1761 = vmatpush3.bf16.msra.mxu1 %v2020_v38 }
  0x5c   : > { %1730 = vmatprep.subr.bf16.mxu0 %v2029_v39  ;;  %1762 = vmatprep.subr.bf16.mxu1 %v2029_v39 }
  0x5d   : > { %1684 = vmatprep.mubr.bf16.mxu0 %v1828_v52  ;;  %1716 = vmatprep.mubr.bf16.mxu1 %v1829_v53 }
  0x5f   : > { %1731 = vmatpush3.bf16.msra.mxu0 %v2029_v39  ;;  %1763 = vmatpush3.bf16.msra.mxu1 %v2029_v39 }
  0x60   : > { %1732 = vmatprep.subr.bf16.mxu0 %v2038_v40  ;;  %1764 = vmatprep.subr.bf16.mxu1 %v2038_v40 }
  0x62   : > { %1685 = vmatmul.mubr.bf16.gmra.mxu0 %v1830_v54  ;;  %1717 = vmatmul.mubr.bf16.gmra.mxu1 %v1831_v55 }
  0x63   : > { %1733 = vmatpush3.bf16.msra.mxu0 %v2038_v40  ;;  %1765 = vmatpush3.bf16.msra.mxu1 %v2038_v40 }
  0x64   : > { %1734 = vmatprep.subr.bf16.mxu0 %v2047_v41  ;;  %1766 = vmatprep.subr.bf16.mxu1 %v2047_v41 }
  0x65   : > { %1736 = vmatprep.mubr.bf16.mxu0 %v1832_v56  ;;  %1768 = vmatprep.mubr.bf16.mxu1 %v1833_v57 }
  0x67   : > { %1735 = vmatpush3.bf16.msra.mxu0 %v2047_v41  ;;  %1767 = vmatpush3.bf16.msra.mxu1 %v2047_v41 }
  0x6a   : > { %1737 = vmatmul.mubr.bf16.vlgmr.msra.gmra.mxu0 %v1834_v58  ;;  %1769 = vmatmul.mubr.bf16.vlgmr.msra.gmra.mxu1 %v1835_v59 }
  0x6b   : > { %1740 = vmatprep.mubr.bf16.mxu0 %v1836_v60  ;;  %1772 = vmatprep.mubr.bf16.mxu1 %v1837_v61 }
  0x72   : > { %1741 = vmatmul.mubr.bf16.gmra.mxu0 %v1838_v62  ;;  %1773 = vmatmul.mubr.bf16.gmra.mxu1 %v1839_v63 }
  0x73   : > { %1744 = vmatprep.mubr.bf16.mxu0 %v1840_v0  ;;  %1776 = vmatprep.mubr.bf16.mxu1 %v1841_v1 }
  0x7a   : > { %1745 = vmatmul.mubr.bf16.gmra.mxu0 %v1842_v2  ;;  %1777 = vmatmul.mubr.bf16.gmra.mxu1 %v1843_v3 }
  0x7b   : > { %1748 = vmatprep.mubr.bf16.mxu0 %v1844_v4  ;;  %1780 = vmatprep.mubr.bf16.mxu1 %v1845_v5 }
  0x82   : > { %1749 = vmatmul.mubr.bf16.gmra.mxu0 %v1846_v6  ;;  %1781 = vmatmul.mubr.bf16.gmra.mxu1 %v1847_v7 }
 0x10a   : > { %v1674_v8 = vpop.f32.mrf.mxu0  ;;  %v1706_v9 = vpop.f32.mrf.mxu1 }
 0x10b   : > { %v859_v40 = vmax.f32 %v1674_v8, %v1706_v9 }
 0x10c   : > { %v632_v10 = vpop.f32.mrf.mxu0  ;;  %v794_v11 = vpop.f32.mrf.mxu1 }
 0x10d   : > { %v857_v43 = vmax.f32 %v632_v10, %v794_v11 }
 0x10e   : > { %v1675_v12 = vpop.f32.mrf.mxu0  ;;  %v1707_v13 = vpop.f32.mrf.mxu1 }
 0x10f   : > { %v860_v47 = vmax.f32 %v1675_v12, %v1707_v13 }
 0x110   : > { %v635_v14 = vpop.f32.mrf.mxu0  ;;  %v797_v15 = vpop.f32.mrf.mxu1 }
 0x111   : > { %v858_v53 = vmax.f32 %v635_v14, %v797_v15 }
 0x112   : > { %v1678_v16 = vpop.f32.mrf.mxu0  ;;  %v1710_v17 = vpop.f32.mrf.mxu1 }
 0x113   : > { %v863_v58 = vmax.f32 %v1678_v16, %v1710_v17 }
 0x114   : > { %v648_v18 = vpop.f32.mrf.mxu0  ;;  %v810_v19 = vpop.f32.mrf.mxu1 }
 0x115   : > { %v861_v62 = vmax.f32 %v648_v18, %v810_v19 }
 0x116   : > { %v2105_v20 = vpop.f32.mrf.mxu0  ;;  %v2107_v21 = vpop.f32.mrf.mxu1 }
 0x117   : > { %v864_v11 = vmax.f32 %v2105_v20, %v2107_v21 }
 0x118   : > { %v2109_v22 = vpop.f32.mrf.mxu0  ;;  %v2111_v23 = vpop.f32.mrf.mxu1 }
 0x119   : > { %v862_v12 = vmax.f32 %v2109_v22, %v2111_v23 }
 0x11a   : > { %v2113_v24 = vpop.f32.mrf.mxu0  ;;  %v2115_v25 = vpop.f32.mrf.mxu1 }
 0x11b   : > { %v867_v21 = vmax.f32 %v2113_v24, %v2115_v25 }
 0x11c   : > { %v2117_v26 = vpop.f32.mrf.mxu0  ;;  %v2119_v27 = vpop.f32.mrf.mxu1 }
 0x11e   : > { %v2121_v28 = vpop.f32.mrf.mxu0  ;;  %v2123_v29 = vpop.f32.mrf.mxu1 }
 0x11f   : > { %v868_v25 = vmax.f32 %v2121_v28, %v2123_v29 }
 0x120   : > { %v2125_v30 = vpop.f32.mrf.mxu0  ;;  %v2127_v31 = vpop.f32.mrf.mxu1 }
 0x122   : > { %v2129_v32 = vpop.f32.mrf.mxu0  ;;  %v2131_v33 = vpop.f32.mrf.mxu1 }
 0x123   : > { %v871_v29 = vmax.f32 %v2129_v32, %v2131_v33 }
 0x124   : > { %v2133_v34 = vpop.f32.mrf.mxu0  ;;  %v2135_v35 = vpop.f32.mrf.mxu1 }
 0x126   : > { %v2137_v36 = vpop.f32.mrf.mxu0  ;;  %v2139_v37 = vpop.f32.mrf.mxu1 }
 0x128   : > { %v2141_v38 = vpop.f32.mrf.mxu0  ;;  %v2143_v39 = vpop.f32.mrf.mxu1 }
 0x12a   : > { %v1738_v41 = vpop.f32.mrf.mxu0  ;;  %v1770_v42 = vpop.f32.mrf.mxu1 }
 0x12b   : > { %v1037_v44 = vmax.f32 %v859_v40, %v1738_v41 }
 0x12c   : > { %v972_v45 = vpop.f32.mrf.mxu0  ;;  %v1150_v46 = vpop.f32.mrf.mxu1 }
 0x12d   : > { %v1215_v48 = vmax.f32 %v1037_v44, %v1770_v42  ;;  %v1035_v49 = vmax.f32 %v857_v43, %v972_v45 }
 0x12e   : > { %v1739_v51 = vpop.f32.mrf.mxu0  ;;  %v1771_v52 = vpop.f32.mrf.mxu1 }
 0x12f   : > { %v1213_v54 = vmax.f32 %v1035_v49, %v1150_v46  ;;  %v1038_v55 = vmax.f32 %v860_v47, %v1739_v51  ;;  %v1238_v59 = vadd.f32 %v2150_v50, %v1215_v48  ;;  %v865_v46 = vmax.f32 %v2117_v26, %v2119_v27 }
 0x130   : > { %v975_v56 = vpop.f32.mrf.mxu0  ;;  %v1153_v57 = vpop.f32.mrf.mxu1 }
 0x131   : > { %v1216_v60 = vmax.f32 %v1038_v55, %v1771_v52  ;;  %v1036_v61 = vmax.f32 %v858_v53, %v975_v56  ;;  %v1236_v1 = vadd.f32 %v2150_v50, %v1213_v54  ;;  %v1254_v7 = vmax.f32 %v1238_v59, 0.0 }
 0x132   : > { %v1742_v63 = vpop.f32.mrf.mxu0  ;;  %v1774_v0 = vpop.f32.mrf.mxu1 }
 0x133   : > { %v1239_v2 = vadd.f32 %v2150_v50, %v1216_v60  ;;  %v1214_v3 = vmax.f32 %v1036_v61, %v1153_v57  ;;  %v1041_v4 = vmax.f32 %v863_v58, %v1742_v63  ;;  %v1252_v16 = vmax.f32 %v1236_v1, 0.0 }
 0x134   : > { %v988_v5 = vpop.f32.mrf.mxu0  ;;  %v1166_v6 = vpop.f32.mrf.mxu1  ;;  %v866_v61 = vmax.f32 %v2125_v30, %v2127_v31 }
 0x135   : > { %v1255_v8 = vmax.f32 %v1239_v2, 0.0  ;;  %v1237_v9 = vadd.f32 %v2150_v50, %v1214_v3  ;;  %v1039_v10 = vmax.f32 %v861_v62, %v988_v5  ;;  %v1219_v13 = vmax.f32 %v1041_v4, %v1774_v0 }
 0x136   : > { %v1743_v14 = vpop.f32.mrf.mxu0  ;;  %v1775_v15 = vpop.f32.mrf.mxu1 }
 0x137   : > { %v1553_v17 = vpack.c.bf16 %v1255_v8, %v1254_v7  ;;  %v1253_v18 = vmax.f32 %v1237_v9, 0.0  ;;  %v1217_v19 = vmax.f32 %v1039_v10, %v1166_v6  ;;  %v1042_v40 = vmax.f32 %v864_v11, %v1743_v14 }
 0x138   : > { %v991_v41 = vpop.f32.mrf.mxu0  ;;  %v1169_v20 = vpop.f32.mrf.mxu1  ;;  %v1242_v42 = vadd.f32 %v2150_v50, %v1219_v13  ;;  %v869_v7 = vmax.f32 %v2133_v34, %v2135_v35  ;;  %v872_v8 = vmax.f32 %v2137_v36, %v2139_v37 }
 0x139   : > { %1585 = vst [vmem:[%s2163_s28 + $0x8] sm:$0xff] %v1553_v17   ;;  %v1548_v22 = vpack.c.bf16 %v1253_v18, %v1252_v16  ;;  %v1040_v23 = vmax.f32 %v862_v12, %v991_v41  ;;  %v1220_v43 = vmax.f32 %v1042_v40, %v1775_v15  ;;  %v1240_v47 = vadd.f32 %v2150_v50, %v1217_v19 }
 0x13a   : > { %v1746_v44 = vpop.f32.mrf.mxu0  ;;  %v1778_v45 = vpop.f32.mrf.mxu1  ;;  %v1258_v56 = vmax.f32 %v1242_v42, 0.0  ;;  %v870_v16 = vmax.f32 %v2141_v38, %v2143_v39 }
 0x13b   : > { %1549 = vst [vmem:[%s2163_s28] sm:$0xff] %v1548_v22   ;;  %v1218_v48 = vmax.f32 %v1040_v23, %v1169_v20  ;;  %v1045_v49 = vmax.f32 %v867_v21, %v1746_v44  ;;  %v1243_v51 = vadd.f32 %v2150_v50, %v1220_v43  ;;  %v1256_v58 = vmax.f32 %v1240_v47, 0.0 }
 0x13c   : > { %v1004_v52 = vpop.f32.mrf.mxu0  ;;  %v1182_v24 = vpop.f32.mrf.mxu1 }
 0x13d   : > { %v1241_v53 = vadd.f32 %v2150_v50, %v1218_v48  ;;  %v1223_v54 = vmax.f32 %v1045_v49, %v1778_v45  ;;  %v1043_v55 = vmax.f32 %v865_v46, %v1004_v52  ;;  %v1259_v57 = vmax.f32 %v1243_v51, 0.0 }
 0x13e   : > { %v1747_v26 = vpop.f32.mrf.mxu0  ;;  %v1779_v27 = vpop.f32.mrf.mxu1 }
 0x13f   : > { %v1257_v59 = vmax.f32 %v1241_v53, 0.0  ;;  %v1046_v60 = vmax.f32 %v868_v25, %v1747_v26  ;;  %v1563_v62 = vpack.c.bf16 %v1259_v57, %v1258_v56  ;;  %v1221_v63 = vmax.f32 %v1043_v55, %v1182_v24 }
 0x140   : > { %v1007_v0 = vpop.f32.mrf.mxu0  ;;  %v1185_v28 = vpop.f32.mrf.mxu1  ;;  %v1246_v2 = vadd.f32 %v2150_v50, %v1223_v54 }
 0x141   : > { %v1558_v1 = vpack.c.bf16 %v1257_v59, %v1256_v58  ;;  %v1224_v3 = vmax.f32 %v1046_v60, %v1779_v27  ;;  %1587 = vst [vmem:[%s2163_s28 + $0x18] sm:$0xff] %v1563_v62   ;;  %v1044_v4 = vmax.f32 %v866_v61, %v1007_v0  ;;  %v1244_v32 = vadd.f32 %v2150_v50, %v1221_v63 }
 0x142   : > { %v1750_v5 = vpop.f32.mrf.mxu0  ;;  %v1782_v6 = vpop.f32.mrf.mxu1  ;;  %v1262_v11 = vmax.f32 %v1246_v2, 0.0 }
 0x143   : > { %1586 = vst [vmem:[%s2163_s28 + $0x10] sm:$0xff] %v1558_v1   ;;  %v1247_v30 = vadd.f32 %v2150_v50, %v1224_v3  ;;  %v1049_v31 = vmax.f32 %v871_v29, %v1750_v5  ;;  %v1222_v33 = vmax.f32 %v1044_v4, %v1185_v28  ;;  %v1260_v18 = vmax.f32 %v1244_v32, 0.0 }
 0x144   : > { %v1020_v9 = vpop.f32.mrf.mxu0  ;;  %v1198_v10 = vpop.f32.mrf.mxu1 }
 0x145   : > { %v1263_v12 = vmax.f32 %v1247_v30, 0.0  ;;  %v1227_v13 = vmax.f32 %v1049_v31, %v1782_v6  ;;  %v1047_v14 = vmax.f32 %v869_v7, %v1020_v9  ;;  %v1245_v15 = vadd.f32 %v2150_v50, %v1222_v33 }
 0x146   : > { %v1751_v34 = vpop.f32.mrf.mxu0  ;;  %v1783_v35 = vpop.f32.mrf.mxu1 }
 0x147   : > { %v1573_v17 = vpack.c.bf16 %v1263_v12, %v1262_v11  ;;  %v1225_v36 = vmax.f32 %v1047_v14, %v1198_v10  ;;  %v1050_v37 = vmax.f32 %v872_v8, %v1751_v34  ;;  %v1261_v19 = vmax.f32 %v1245_v15, 0.0 }
 0x148   : > { %v1023_v40 = vpop.f32.mrf.mxu0  ;;  %v1250_v41 = vadd.f32 %v2150_v50, %v1227_v13  ;;  %v1201_v23 = vpop.f32.mrf.mxu1 }
 0x149   : > { %1589 = vst [vmem:[%s2163_s28 + $0x28] sm:$0xff] %v1573_v17   ;;  %v1228_v20 = vmax.f32 %v1050_v37, %v1783_v35  ;;  %v1048_v21 = vmax.f32 %v870_v16, %v1023_v40  ;;  %v1568_v22 = vpack.c.bf16 %v1261_v19, %v1260_v18  ;;  %v1248_v42 = vadd.f32 %v2150_v50, %v1225_v36 }
 0x14a   : > { %v1266_v43 = vmax.f32 %v1250_v41, 0.0 }
 0x14b   : > { %v1251_v38 = vadd.f32 %v2150_v50, %v1228_v20  ;;  %v1226_v39 = vmax.f32 %v1048_v21, %v1201_v23  ;;  %1588 = vst [vmem:[%s2163_s28 + $0x20] sm:$0xff] %v1568_v22   ;;  %v1264_v46 = vmax.f32 %v1248_v42, 0.0 }
 0x14d   : > { %v1267_v44 = vmax.f32 %v1251_v38, 0.0  ;;  %v1249_v45 = vadd.f32 %v2150_v50, %v1226_v39 }
 0x14f   : > { %v1583_v47 = vpack.c.bf16 %v1267_v44, %v1266_v43  ;;  %v1265_v48 = vmax.f32 %v1249_v45, 0.0 }
 0x151   : > { %1591 = vst [vmem:[%s2163_s28 + $0x38] sm:$0xff] %v1583_v47   ;;  %v1578_v49 = vpack.c.bf16 %v1265_v48, %v1264_v46 }
 0x153   : > { %1590 = vst [vmem:[%s2163_s28 + $0x30] sm:$0xff] %v1578_v49  }
 0x154 PF: > { %p10_p9 = scmp.ge.s32.totalorder %s1909_s16, 6   ;;  %s2215_s12 = smov %s1866_s13 }
 0x155   : > { %s2216_s13 = smov %s1918_s19  ;;  %s2217_s14 = smov %s1909_s16 }
 0x156   :  { %12 = sbr.rel (!%p10_p9) target bundleno = 2 (0x2), region = 111 }

// kernel: lenet_rgb_forward.4
= control target key start
LH: loop header
LB: loop body
LE: loop exit
PB: predicated region body
PF: predicated region fallthrough
CT: control target
= control target key end

     0   :  { %s1247_s1 = inlined_call_operand.vmem [shape: bf16[256,128], index: 1, kind: input, shape index: {}]   ;;  %s1248_s0 = inlined_call_operand.vmem [shape: bf16[4,56,256], index: 0, kind: input, shape index: {}]   ;;  %s1249_s2 = inlined_call_operand.vmem [shape: f32[1,128], index: 2, kind: input, shape index: {}]   ;;  %s1250_s3 = inlined_call_operand.vmem [shape: bf16[56,128], index: 3, kind: output, shape index: {}]  }
   0x1   :  { %v921_v0 = vld [vmem:[%s1247_s1 + $0x78] sm:$0xff]   ;;  %v923_v2 = vld [vmem:[%s1247_s1 + $0x70] sm:$0xff]   ;;  %v925_v4 = vld [vmem:[%s1247_s1 + $0x68] sm:$0xff]  }
   0x2   :  { %v922_v1 = vld [vmem:[%s1247_s1 + $0x38] sm:$0xff]   ;;  %761 = vmatprep.subr.bf16.mxu0 %v921_v0  ;;  %801 = vmatprep.subr.bf16.mxu1 %v921_v0  ;;  %v924_v3 = vld [vmem:[%s1247_s1 + $0x30] sm:$0xff]   ;;  %v1019_v5 = vld [vmem:[%s1247_s1 + $0x28] sm:$0xff]  }
   0x3   :  { %762 = vmatpush3.bf16.msra.mxu0 %v922_v1  ;;  %802 = vmatpush3.bf16.msra.mxu1 %v922_v1  ;;  %v1024_v6 = vld [vmem:[%s1247_s1 + $0x60] sm:$0xff]   ;;  %v1038_v8 = vld [vmem:[%s1247_s1 + $0x58] sm:$0xff]   ;;  %v1052_v10 = vld [vmem:[%s1247_s1 + $0x50] sm:$0xff]  }
   0x4   :  { %763 = vmatprep.subr.bf16.mxu0 %v923_v2  ;;  %803 = vmatprep.subr.bf16.mxu1 %v923_v2  ;;  %v1031_v7 = vld [vmem:[%s1247_s1 + $0x20] sm:$0xff]   ;;  %v1045_v9 = vld [vmem:[%s1247_s1 + $0x18] sm:$0xff]   ;;  %v1065_v13 = vld [vmem:[%s1247_s1 + $0x10] sm:$0xff]  }
   0x5   :  { %v939_v11 = vld [vmem:[%s1248_s0 + $0x4] ss:$8 sps:$4 sm:$0xff]   ;;  %v937_v18 = vld [vmem:[%s1248_s0] ss:$8 sps:$4 sm:$0xff]   ;;  %v943_v20 = vld [vmem:[%s1248_s0 + $0x14] ss:$8 sps:$4 sm:$0xff]  }
   0x6   :  { %v942_v12 = vld [vmem:[%s1248_s0 + $0x3c] ss:$8 sps:$4 sm:$0xff]   ;;  %v1072_v14 = vld [vmem:[%s1247_s1 + $0x48] sm:$0xff]   ;;  %219 = vmatprep.mubr.bf16.mxu0 %v939_v11  ;;  %v940_v19 = vld [vmem:[%s1248_s0 + $0x38] ss:$8 sps:$4 sm:$0xff]  }
   0x7   :  { %764 = vmatpush3.bf16.msra.mxu0 %v924_v3  ;;  %804 = vmatpush3.bf16.msra.mxu1 %v924_v3  ;;  %v1079_v15 = vld [vmem:[%s1247_s1 + $0x8] sm:$0xff]   ;;  %v1086_v16 = vld [vmem:[%s1247_s1 + $0x40] sm:$0xff]   ;;  %v947_v22 = vld [vmem:[%s1248_s0 + $0x10] ss:$8 sps:$4 sm:$0xff]  }
   0x8   :  { %765 = vmatprep.subr.bf16.mxu0 %v925_v4  ;;  %805 = vmatprep.subr.bf16.mxu1 %v925_v4  ;;  %v1093_v17 = vld [vmem:[%s1247_s1] sm:$0xff]   ;;  %v945_v21 = vld [vmem:[%s1248_s0 + $0x4c] ss:$8 sps:$4 sm:$0xff]   ;;  %v948_v23 = vld [vmem:[%s1248_s0 + $0x48] ss:$8 sps:$4 sm:$0xff]  }
   0x9   :  { %328 = vmatprep.mubr.bf16.mxu1 %v942_v12  ;;  %v949_v24 = vld [vmem:[%s1248_s0 + $0x24] ss:$8 sps:$4 sm:$0xff]   ;;  %v953_v26 = vld [vmem:[%s1248_s0 + $0x20] ss:$8 sps:$4 sm:$0xff]   ;;  %v53_v28 = vld [vmem:[%s1248_s0 + $0x30] sm:$0xff] }
   0xa   :  { %v951_v25 = vld [vmem:[%s1248_s0 + $0x5c] ss:$8 sps:$4 sm:$0xff]   ;;  %v954_v27 = vld [vmem:[%s1248_s0 + $0x58] ss:$8 sps:$4 sm:$0xff]   ;;  %v690_v29 = vld [vmem:[%s1248_s0 + $0x68] sm:$0xff]  ;;  %v667_v30 = vcombine.high %v53_v28, %v53_v28  ;;  %v666_v32 = vcombine.low %v53_v28, %v53_v28 }
   0xb   :  { %766 = vmatpush3.bf16.msra.mxu0 %v1019_v5  ;;  %806 = vmatpush3.bf16.msra.mxu1 %v1019_v5  ;;  %v698_v31 = vcombine.high %v690_v29, %v690_v29  ;;  %v697_v33 = vcombine.low %v690_v29, %v690_v29  ;;  %v961_v34 = vld [vmem:[%s1248_s0 + $0x74] ss:$8 sps:$4 sm:$0xff]   ;;  %v959_v36 = vld [vmem:[%s1248_s0 + $0x70] ss:$8 sps:$4 sm:$0xff]   ;;  %v965_v38 = vld [vmem:[%s1248_s0 + $0x84] ss:$8 sps:$4 sm:$0xff]  }
   0xc   :  { %767 = vmatprep.subr.bf16.mxu0 %v1024_v6  ;;  %807 = vmatprep.subr.bf16.mxu1 %v1024_v6  ;;  %v964_v35 = vld [vmem:[%s1248_s0 + $0xac] ss:$8 sps:$4 sm:$0xff]   ;;  %v962_v37 = vld [vmem:[%s1248_s0 + $0xa8] ss:$8 sps:$4 sm:$0xff]   ;;  %v967_v39 = vld [vmem:[%s1248_s0 + $0xbc] ss:$8 sps:$4 sm:$0xff]  }
   0xd   :  { %v969_v40 = vld [vmem:[%s1248_s0 + $0x80] ss:$8 sps:$4 sm:$0xff]   ;;  %v971_v42 = vld [vmem:[%s1248_s0 + $0x94] ss:$8 sps:$4 sm:$0xff]   ;;  %v975_v46 = vld [vmem:[%s1248_s0 + $0x90] ss:$8 sps:$4 sm:$0xff]  }
   0xe   :  { %v970_v41 = vld [vmem:[%s1248_s0 + $0xb8] ss:$8 sps:$4 sm:$0xff]   ;;  %v973_v43 = vld [vmem:[%s1248_s0 + $0xcc] ss:$8 sps:$4 sm:$0xff]   ;;  %v976_v47 = vld [vmem:[%s1248_s0 + $0xc8] ss:$8 sps:$4 sm:$0xff]  }
   0xf   :  { %768 = vmatpush3.bf16.msra.mxu0 %v1031_v7  ;;  %808 = vmatpush3.bf16.msra.mxu1 %v1031_v7  ;;  %v705_v44 = vld [vmem:[%s1248_s0 + $0xa0] sm:$0xff]  ;;  %v720_v45 = vld [vmem:[%s1248_s0 + $0xd8] sm:$0xff] }
  0x10   :  { %769 = vmatprep.subr.bf16.mxu0 %v1038_v8  ;;  %809 = vmatprep.subr.bf16.mxu1 %v1038_v8  ;;  %v713_v48 = vcombine.high %v705_v44, %v705_v44  ;;  %v728_v49 = vcombine.high %v720_v45, %v720_v45  ;;  %v712_v50 = vcombine.low %v705_v44, %v705_v44 }
  0x11   :  { %v727_v51 = vcombine.low %v720_v45, %v720_v45 }
  0x13   :  { %770 = vmatpush3.bf16.msra.mxu0 %v1045_v9  ;;  %810 = vmatpush3.bf16.msra.mxu1 %v1045_v9 }
  0x14   :  { %771 = vmatprep.subr.bf16.mxu0 %v1052_v10  ;;  %811 = vmatprep.subr.bf16.mxu1 %v1052_v10 }
  0x17   :  { %772 = vmatpush3.bf16.msra.mxu0 %v1065_v13  ;;  %812 = vmatpush3.bf16.msra.mxu1 %v1065_v13 }
  0x18   :  { %773 = vmatprep.subr.bf16.mxu0 %v1072_v14  ;;  %813 = vmatprep.subr.bf16.mxu1 %v1072_v14 }
  0x1b   :  { %774 = vmatpush3.bf16.msra.mxu0 %v1079_v15  ;;  %814 = vmatpush3.bf16.msra.mxu1 %v1079_v15 }
  0x1c   :  { %775 = vmatprep.subr.bf16.mxu0 %v1086_v16  ;;  %815 = vmatprep.subr.bf16.mxu1 %v1086_v16 }
  0x1f   :  { %776 = vmatpush3.bf16.msra.mxu0 %v1093_v17  ;;  %816 = vmatpush3.bf16.msra.mxu1 %v1093_v17 }
  0x20   :  { %841 = vmatprep.subr.bf16.mxu0 %v921_v0  ;;  %881 = vmatprep.subr.bf16.mxu1 %v921_v0 }
  0x22   :  { %220 = vmatmul.mubr.bf16.vlgmr.msra.gmra.mxu0 %v937_v18  ;;  %329 = vmatmul.mubr.bf16.vlgmr.msra.gmra.mxu1 %v940_v19 }
  0x23   :  { %842 = vmatpush3.bf16.msra.mxu0 %v922_v1  ;;  %882 = vmatpush3.bf16.msra.mxu1 %v922_v1 }
  0x24   :  { %843 = vmatprep.subr.bf16.mxu0 %v923_v2  ;;  %883 = vmatprep.subr.bf16.mxu1 %v923_v2 }
  0x25   :  { %227 = vmatprep.mubr.bf16.mxu0 %v943_v20  ;;  %336 = vmatprep.mubr.bf16.mxu1 %v945_v21 }
  0x27   :  { %844 = vmatpush3.bf16.msra.mxu0 %v924_v3  ;;  %884 = vmatpush3.bf16.msra.mxu1 %v924_v3 }
  0x28   :  { %845 = vmatprep.subr.bf16.mxu0 %v925_v4  ;;  %885 = vmatprep.subr.bf16.mxu1 %v925_v4 }
  0x2a   :  { %228 = vmatmul.mubr.bf16.gmra.mxu0 %v947_v22  ;;  %337 = vmatmul.mubr.bf16.gmra.mxu1 %v948_v23 }
  0x2b   :  { %846 = vmatpush3.bf16.msra.mxu0 %v1019_v5  ;;  %886 = vmatpush3.bf16.msra.mxu1 %v1019_v5 }
  0x2c   :  { %847 = vmatprep.subr.bf16.mxu0 %v1024_v6  ;;  %887 = vmatprep.subr.bf16.mxu1 %v1024_v6 }
  0x2d   :  { %235 = vmatprep.mubr.bf16.mxu0 %v949_v24  ;;  %344 = vmatprep.mubr.bf16.mxu1 %v951_v25 }
  0x2f   :  { %848 = vmatpush3.bf16.msra.mxu0 %v1031_v7  ;;  %888 = vmatpush3.bf16.msra.mxu1 %v1031_v7 }
  0x30   :  { %849 = vmatprep.subr.bf16.mxu0 %v1038_v8  ;;  %889 = vmatprep.subr.bf16.mxu1 %v1038_v8 }
  0x32   :  { %236 = vmatmul.mubr.bf16.gmra.mxu0 %v953_v26  ;;  %345 = vmatmul.mubr.bf16.gmra.mxu1 %v954_v27 }
  0x33   :  { %850 = vmatpush3.bf16.msra.mxu0 %v1045_v9  ;;  %890 = vmatpush3.bf16.msra.mxu1 %v1045_v9 }
  0x34   :  { %851 = vmatprep.subr.bf16.mxu0 %v1052_v10  ;;  %891 = vmatprep.subr.bf16.mxu1 %v1052_v10 }
  0x35   :  { %243 = vmatprep.mubr.bf16.mxu0 %v667_v30  ;;  %352 = vmatprep.mubr.bf16.mxu1 %v698_v31 }
  0x37   :  { %852 = vmatpush3.bf16.msra.mxu0 %v1065_v13  ;;  %892 = vmatpush3.bf16.msra.mxu1 %v1065_v13 }
  0x38   :  { %853 = vmatprep.subr.bf16.mxu0 %v1072_v14  ;;  %893 = vmatprep.subr.bf16.mxu1 %v1072_v14 }
  0x3a   :  { %244 = vmatmul.mubr.bf16.gmra.mxu0 %v666_v32  ;;  %353 = vmatmul.mubr.bf16.gmra.mxu1 %v697_v33 }
  0x3b   :  { %854 = vmatpush3.bf16.msra.mxu0 %v1079_v15  ;;  %894 = vmatpush3.bf16.msra.mxu1 %v1079_v15 }
  0x3c   :  { %855 = vmatprep.subr.bf16.mxu0 %v1086_v16  ;;  %895 = vmatprep.subr.bf16.mxu1 %v1086_v16 }
  0x3d   :  { %444 = vmatprep.mubr.bf16.mxu0 %v961_v34  ;;  %560 = vmatprep.mubr.bf16.mxu1 %v964_v35 }
  0x3f   :  { %856 = vmatpush3.bf16.msra.mxu0 %v1093_v17  ;;  %896 = vmatpush3.bf16.msra.mxu1 %v1093_v17 }
  0x42   :  { %445 = vmatmul.mubr.bf16.vlgmr.msra.gmra.mxu0 %v959_v36  ;;  %561 = vmatmul.mubr.bf16.vlgmr.msra.gmra.mxu1 %v962_v37 }
  0x43   :  { %452 = vmatprep.mubr.bf16.mxu0 %v965_v38  ;;  %568 = vmatprep.mubr.bf16.mxu1 %v967_v39 }
  0x4a   :  { %453 = vmatmul.mubr.bf16.gmra.mxu0 %v969_v40  ;;  %569 = vmatmul.mubr.bf16.gmra.mxu1 %v970_v41  ;;  %v1218_v41 = vld [vmem:[%s1249_s2] ss:$0 sm:$0xff] }
  0x4b   :  { %460 = vmatprep.mubr.bf16.mxu0 %v971_v42  ;;  %576 = vmatprep.mubr.bf16.mxu1 %v973_v43 }
  0x52   :  { %461 = vmatmul.mubr.bf16.gmra.mxu0 %v975_v46  ;;  %577 = vmatmul.mubr.bf16.gmra.mxu1 %v976_v47 }
  0x53   :  { %468 = vmatprep.mubr.bf16.mxu0 %v713_v48  ;;  %584 = vmatprep.mubr.bf16.mxu1 %v728_v49 }
  0x5a   :  { %469 = vmatmul.mubr.bf16.gmra.mxu0 %v712_v50  ;;  %585 = vmatmul.mubr.bf16.gmra.mxu1 %v727_v51 }
  0xe2   :  { %v777_v52 = vpop.f32.mrf.mxu0  ;;  %v817_v53 = vpop.f32.mrf.mxu1 }
  0xe4   :  { %v778_v54 = vpop.f32.mrf.mxu0  ;;  %v818_v55 = vpop.f32.mrf.mxu1 }
  0xe5   :  { %v779_v20 = vadd.f32 %v778_v54, %v777_v52  ;;  %v819_v21 = vadd.f32 %v818_v55, %v817_v53 }
  0xe6   :  { %v780_v56 = vpop.f32.mrf.mxu0  ;;  %v820_v57 = vpop.f32.mrf.mxu1 }
  0xe7   :  { %v360_v28 = vmax.f32 %v779_v20, %v819_v21 }
  0xe8   :  { %v781_v58 = vpop.f32.mrf.mxu0  ;;  %v821_v59 = vpop.f32.mrf.mxu1 }
  0xe9   :  { %v782_v24 = vadd.f32 %v781_v58, %v780_v56  ;;  %v822_v25 = vadd.f32 %v821_v59, %v820_v57 }
  0xea   :  { %v783_v60 = vpop.f32.mrf.mxu0  ;;  %v823_v61 = vpop.f32.mrf.mxu1 }
  0xeb   :  { %v361_v34 = vmax.f32 %v782_v24, %v822_v25 }
  0xec   :  { %v784_v62 = vpop.f32.mrf.mxu0  ;;  %v824_v63 = vpop.f32.mrf.mxu1 }
  0xed   :  { %v785_v37 = vadd.f32 %v784_v62, %v783_v60  ;;  %v825_v38 = vadd.f32 %v824_v63, %v823_v61 }
  0xee   :  { %v786_v0 = vpop.f32.mrf.mxu0  ;;  %v826_v1 = vpop.f32.mrf.mxu1 }
  0xef   :  { %v362_v50 = vmax.f32 %v785_v37, %v825_v38 }
  0xf0   :  { %v787_v2 = vpop.f32.mrf.mxu0  ;;  %v827_v3 = vpop.f32.mrf.mxu1 }
  0xf1   :  { %v788_v46 = vadd.f32 %v787_v2, %v786_v0  ;;  %v828_v47 = vadd.f32 %v827_v3, %v826_v1 }
  0xf2   :  { %v789_v4 = vpop.f32.mrf.mxu0  ;;  %v829_v5 = vpop.f32.mrf.mxu1 }
  0xf3   :  { %v363_v59 = vmax.f32 %v788_v46, %v828_v47 }
  0xf4   :  { %v790_v6 = vpop.f32.mrf.mxu0  ;;  %v830_v7 = vpop.f32.mrf.mxu1 }
  0xf5   :  { %v791_v60 = vadd.f32 %v790_v6, %v789_v4  ;;  %v831_v61 = vadd.f32 %v830_v7, %v829_v5 }
  0xf6   :  { %v1199_v8 = vpop.f32.mrf.mxu0  ;;  %v1201_v9 = vpop.f32.mrf.mxu1 }
  0xf7   :  { %v364_v5 = vmax.f32 %v791_v60, %v831_v61 }
  0xf8   :  { %v1203_v10 = vpop.f32.mrf.mxu0  ;;  %v1205_v11 = vpop.f32.mrf.mxu1 }
  0xf9   :  { %v794_v21 = vadd.f32 %v1203_v10, %v1199_v8 }
  0xfa   :  { %v1207_v12 = vpop.f32.mrf.mxu0  ;;  %v1209_v13 = vpop.f32.mrf.mxu1 }
  0xfc   :  { %v1211_v14 = vpop.f32.mrf.mxu0  ;;  %v1213_v15 = vpop.f32.mrf.mxu1 }
  0xfe   :  { %v798_v16 = vpop.f32.mrf.mxu0  ;;  %v838_v17 = vpop.f32.mrf.mxu1 }
 0x100   :  { %v799_v18 = vpop.f32.mrf.mxu0  ;;  %v839_v19 = vpop.f32.mrf.mxu1 }
 0x102   :  { %v857_v22 = vpop.f32.mrf.mxu0  ;;  %v897_v23 = vpop.f32.mrf.mxu1 }
 0x104   :  { %v858_v26 = vpop.f32.mrf.mxu0  ;;  %v898_v27 = vpop.f32.mrf.mxu1 }
 0x105   :  { %v859_v29 = vadd.f32 %v858_v26, %v857_v22  ;;  %v899_v33 = vadd.f32 %v898_v27, %v897_v23  ;;  %v834_v22 = vadd.f32 %v1205_v11, %v1201_v9  ;;  %v797_v9 = vadd.f32 %v1211_v14, %v1207_v12 }
 0x106   :  { %v860_v30 = vpop.f32.mrf.mxu0  ;;  %v900_v31 = vpop.f32.mrf.mxu1  ;;  %v837_v11 = vadd.f32 %v1213_v15, %v1209_v13 }
 0x107   :  { %v476_v32 = vmax.f32 %v360_v28, %v859_v29  ;;  %v365_v10 = vmax.f32 %v794_v21, %v834_v22 }
 0x108   :  { %v861_v35 = vpop.f32.mrf.mxu0  ;;  %v901_v36 = vpop.f32.mrf.mxu1 }
 0x109   :  { %v592_v39 = vmax.f32 %v476_v32, %v899_v33  ;;  %v862_v40 = vadd.f32 %v861_v35, %v860_v30  ;;  %v902_v45 = vadd.f32 %v901_v36, %v900_v31 }
 0x10a   :  { %v863_v42 = vpop.f32.mrf.mxu0  ;;  %v903_v43 = vpop.f32.mrf.mxu1 }
 0x10b   :  { %v477_v44 = vmax.f32 %v361_v34, %v862_v40  ;;  %v606_v51 = vadd.f32 %v1218_v41, %v592_v39 }
 0x10c   :  { %v864_v48 = vpop.f32.mrf.mxu0  ;;  %v904_v49 = vpop.f32.mrf.mxu1 }
 0x10d   :  { %v593_v52 = vmax.f32 %v477_v44, %v902_v45  ;;  %v865_v53 = vadd.f32 %v864_v48, %v863_v42  ;;  %v905_v58 = vadd.f32 %v904_v49, %v903_v43  ;;  %v613_v0 = vmax.f32 %v606_v51, 0.0 }
 0x10e   :  { %v866_v54 = vpop.f32.mrf.mxu0  ;;  %v906_v55 = vpop.f32.mrf.mxu1  ;;  %v366_v43 = vmax.f32 %v797_v9, %v837_v11 }
 0x10f   :  { %v607_v56 = vadd.f32 %v1218_v41, %v593_v52  ;;  %v478_v57 = vmax.f32 %v362_v50, %v865_v53 }
 0x110   :  { %v867_v62 = vpop.f32.mrf.mxu0  ;;  %v907_v63 = vpop.f32.mrf.mxu1 }
 0x111   :  { %v614_v1 = vmax.f32 %v607_v56, 0.0  ;;  %v594_v2 = vmax.f32 %v478_v57, %v905_v58  ;;  %v868_v3 = vadd.f32 %v867_v62, %v866_v54  ;;  %v908_v20 = vadd.f32 %v907_v63, %v906_v55 }
 0x112   :  { %v869_v16 = vpop.f32.mrf.mxu0  ;;  %v909_v17 = vpop.f32.mrf.mxu1 }
 0x113   :  { %v747_v18 = vpack.c.bf16 %v614_v1, %v613_v0  ;;  %v479_v19 = vmax.f32 %v363_v59, %v868_v3  ;;  %v608_v6 = vadd.f32 %v1218_v41, %v594_v2 }
 0x114   :  { %v870_v23 = vpop.f32.mrf.mxu0  ;;  %v910_v4 = vpop.f32.mrf.mxu1 }
 0x115   :  { %748 = vst [vmem:[%s1250_s3] sm:$0xff] %v747_v18   ;;  %v595_v7 = vmax.f32 %v479_v19, %v908_v20  ;;  %v871_v24 = vadd.f32 %v870_v23, %v869_v16  ;;  %v911_v8 = vadd.f32 %v910_v4, %v909_v17  ;;  %v615_v31 = vmax.f32 %v608_v6, 0.0 }
 0x116   :  { %v872_v25 = vpop.f32.mrf.mxu0  ;;  %v912_v26 = vpop.f32.mrf.mxu1 }
 0x117   :  { %v609_v27 = vadd.f32 %v1218_v41, %v595_v7  ;;  %v480_v28 = vmax.f32 %v364_v5, %v871_v24 }
 0x118   :  { %v873_v29 = vpop.f32.mrf.mxu0  ;;  %v913_v30 = vpop.f32.mrf.mxu1 }
 0x119   :  { %v616_v32 = vmax.f32 %v609_v27, 0.0  ;;  %v596_v33 = vmax.f32 %v480_v28, %v911_v8  ;;  %v874_v34 = vadd.f32 %v873_v29, %v872_v25  ;;  %v914_v39 = vadd.f32 %v913_v30, %v912_v26 }
 0x11a   :  { %v875_v35 = vpop.f32.mrf.mxu0  ;;  %v915_v36 = vpop.f32.mrf.mxu1 }
 0x11b   :  { %v752_v37 = vpack.c.bf16 %v616_v32, %v615_v31  ;;  %v481_v38 = vmax.f32 %v365_v10, %v874_v34  ;;  %v610_v12 = vadd.f32 %v1218_v41, %v596_v33 }
 0x11c   :  { %v876_v40 = vpop.f32.mrf.mxu0  ;;  %v916_v42 = vpop.f32.mrf.mxu1 }
 0x11d   :  { %759 = vst [vmem:[%s1250_s3 + $0x8] sm:$0xff] %v752_v37   ;;  %v597_v13 = vmax.f32 %v481_v38, %v914_v39  ;;  %v877_v14 = vadd.f32 %v876_v40, %v875_v35  ;;  %v917_v47 = vadd.f32 %v916_v42, %v915_v36  ;;  %v617_v50 = vmax.f32 %v610_v12, 0.0 }
 0x11e   :  { %v878_v15 = vpop.f32.mrf.mxu0  ;;  %v918_v44 = vpop.f32.mrf.mxu1 }
 0x11f   :  { %v611_v45 = vadd.f32 %v1218_v41, %v597_v13  ;;  %v482_v46 = vmax.f32 %v366_v43, %v877_v14 }
 0x120   :  { %v879_v48 = vpop.f32.mrf.mxu0  ;;  %v919_v49 = vpop.f32.mrf.mxu1 }
 0x121   :  { %v618_v51 = vmax.f32 %v611_v45, 0.0  ;;  %v598_v52 = vmax.f32 %v482_v46, %v917_v47 }
 0x123   :  { %v757_v53 = vpack.c.bf16 %v618_v51, %v617_v50  ;;  %v612_v54 = vadd.f32 %v1218_v41, %v598_v52 }
 0x125   :  { %760 = vst [vmem:[%s1250_s3 + $0x10] sm:$0xff] %v757_v53   ;;  %v619_v55 = vmax.f32 %v612_v54, 0.0 }
 0x127   :  { %v743_v56 = vpack.c.bf16 %v619_v55, %v619_v55 }
 0x129   :  { %655 = vst [vmem:[%s1250_s3 + $0x18] sm:$0xf] %v743_v56 }

// kernel: lenet_rgb_forward.5
= control target key start
LH: loop header
LB: loop body
LE: loop exit
PB: predicated region body
PF: predicated region fallthrough
CT: control target
= control target key end

     0   :  { %v828_v39 = vmov 0.0   ;;  %vm829_vm0 = vmmov 0   ;;  %s1050_s1 = inlined_call_operand.vmem [shape: bf16[512,128], index: 1, kind: input, shape index: {}]   ;;  %s1051_s0 = inlined_call_operand.vmem [shape: bf16[8,512], index: 0, kind: input, shape index: {}]   ;;  %s1052_s3 = inlined_call_operand.vmem [shape: bf16[128,128], index: 3, kind: input, shape index: {}]   ;;  %s1053_s5 = inlined_call_operand.vmem [shape: bf16[128,128], index: 5, kind: input, shape index: {}]   ;;  %s1054_s2 = inlined_call_operand.vmem [shape: f32[1,128], index: 2, kind: input, shape index: {}]   ;;  %s1055_s4 = inlined_call_operand.vmem [shape: f32[1,128], index: 4, kind: input, shape index: {}]   ;;  %s1056_s6 = inlined_call_operand.vmem [shape: f32[1,128], index: 6, kind: input, shape index: {}]   ;;  %s1057_s7 = inlined_call_operand.vmem [shape: f32[8,128], index: 7, kind: output, shape index: {}]  }
   0x1   :  { %v776_v0 = vld [vmem:[%s1050_s1 + $0x78] sm:$0xff]   ;;  %v780_v4 = vld [vmem:[%s1050_s1 + $0x70] sm:$0xff]   ;;  %v784_v8 = vld [vmem:[%s1050_s1 + $0x68] sm:$0xff]  }
   0x2   :  { %v777_v1 = vld [vmem:[%s1050_s1 + $0xf8] sm:$0xff]   ;;  %672 = vmatprep.subr.bf16.mxu0 %v776_v0  ;;  %v781_v5 = vld [vmem:[%s1050_s1 + $0xf0] sm:$0xff]   ;;  %v785_v9 = vld [vmem:[%s1050_s1 + $0xe8] sm:$0xff]  }
   0x3   :  { %v778_v2 = vld [vmem:[%s1050_s1 + $0x38] sm:$0xff]   ;;  %694 = vmatprep.subr.bf16.mxu1 %v777_v1  ;;  %v782_v6 = vld [vmem:[%s1050_s1 + $0x30] sm:$0xff]   ;;  %v786_v10 = vld [vmem:[%s1050_s1 + $0x28] sm:$0xff]  }
   0x4   :  { %v779_v3 = vld [vmem:[%s1050_s1 + $0xb8] sm:$0xff]   ;;  %673 = vmatpush3.bf16.msra.mxu0 %v778_v2  ;;  %v783_v7 = vld [vmem:[%s1050_s1 + $0xb0] sm:$0xff]   ;;  %v787_v11 = vld [vmem:[%s1050_s1 + $0xa8] sm:$0xff]  }
   0x5   :  { %695 = vmatpush3.bf16.msra.mxu1 %v779_v3  ;;  %674 = vmatprep.subr.bf16.mxu0 %v780_v4  ;;  %v788_v12 = vld [vmem:[%s1050_s1 + $0x60] sm:$0xff]   ;;  %v792_v16 = vld [vmem:[%s1050_s1 + $0x58] sm:$0xff]   ;;  %v796_v20 = vld [vmem:[%s1050_s1 + $0x50] sm:$0xff]  }
   0x6   :  { %696 = vmatprep.subr.bf16.mxu1 %v781_v5  ;;  %v789_v13 = vld [vmem:[%s1050_s1 + $0xe0] sm:$0xff]   ;;  %v793_v17 = vld [vmem:[%s1050_s1 + $0xd8] sm:$0xff]   ;;  %v797_v21 = vld [vmem:[%s1050_s1 + $0xd0] sm:$0xff]  }
   0x7   :  { %v790_v14 = vld [vmem:[%s1050_s1 + $0x20] sm:$0xff]   ;;  %v794_v18 = vld [vmem:[%s1050_s1 + $0x18] sm:$0xff]   ;;  %v798_v22 = vld [vmem:[%s1050_s1 + $0x10] sm:$0xff]  }
   0x8   :  { %675 = vmatpush3.bf16.msra.mxu0 %v782_v6  ;;  %v791_v15 = vld [vmem:[%s1050_s1 + $0xa0] sm:$0xff]   ;;  %v795_v19 = vld [vmem:[%s1050_s1 + $0x98] sm:$0xff]   ;;  %v799_v23 = vld [vmem:[%s1050_s1 + $0x90] sm:$0xff]  }
   0x9   :  { %697 = vmatpush3.bf16.msra.mxu1 %v783_v7  ;;  %676 = vmatprep.subr.bf16.mxu0 %v784_v8  ;;  %v800_v24 = vld [vmem:[%s1050_s1 + $0x48] sm:$0xff]   ;;  %v804_v28 = vld [vmem:[%s1050_s1 + $0x40] sm:$0xff]   ;;  %v812_v38 = vld [vmem:[%s1052_s3 + $0x38] sm:$0xff]  }
   0xa   :  { %698 = vmatprep.subr.bf16.mxu1 %v785_v9  ;;  %v801_v25 = vld [vmem:[%s1050_s1 + $0xc8] sm:$0xff]   ;;  %v805_v29 = vld [vmem:[%s1050_s1 + $0xc0] sm:$0xff]   ;;  %v813_v40 = vld [vmem:[%s1052_s3 + $0x30] sm:$0xff]  }
   0xb   :  { %v802_v26 = vld [vmem:[%s1050_s1 + $0x8] sm:$0xff]   ;;  %v806_v30 = vld [vmem:[%s1050_s1] sm:$0xff]   ;;  %v816_v43 = vld [vmem:[%s1052_s3 + $0x18] sm:$0xff]  }
   0xc   :  { %677 = vmatpush3.bf16.msra.mxu0 %v786_v10  ;;  %v803_v27 = vld [vmem:[%s1050_s1 + $0x88] sm:$0xff]   ;;  %v807_v31 = vld [vmem:[%s1050_s1 + $0x80] sm:$0xff]   ;;  %v817_v44 = vld [vmem:[%s1052_s3 + $0x10] sm:$0xff]  }
   0xd   :  { %699 = vmatpush3.bf16.msra.mxu1 %v787_v11  ;;  %678 = vmatprep.subr.bf16.mxu0 %v788_v12  ;;  %v27_v32 = vld [vmem:[%s1051_s0] sm:$0xff]  ;;  %v28_v33 = vld [vmem:[%s1051_s0 + $0x8] sm:$0xff]  ;;  %v820_v47 = vld [vmem:[%s1053_s5 + $0x38] sm:$0xff]  }
   0xe   :  { %700 = vmatprep.subr.bf16.mxu1 %v789_v13  ;;  %v618_v34 = vcombine.low %v27_v32, %v27_v32  ;;  %v619_v35 = vcombine.high %v27_v32, %v27_v32  ;;  %v620_v36 = vcombine.low %v28_v33, %v28_v33  ;;  %v621_v37 = vcombine.high %v28_v33, %v28_v33  ;;  %v814_v41 = vld [vmem:[%s1052_s3 + $0x28] sm:$0xff]   ;;  %v815_v42 = vld [vmem:[%s1052_s3 + $0x20] sm:$0xff]   ;;  %v821_v48 = vld [vmem:[%s1053_s5 + $0x30] sm:$0xff]  }
   0xf   :  { %v818_v45 = vld [vmem:[%s1052_s3 + $0x8] sm:$0xff]   ;;  %v819_v46 = vld [vmem:[%s1052_s3] sm:$0xff]   ;;  %v824_v51 = vld [vmem:[%s1053_s5 + $0x18] sm:$0xff]  }
  0x10   :  { %679 = vmatpush3.bf16.msra.mxu0 %v790_v14  ;;  %338 = vmatprep.mubr.bf16.mxu0 %v619_v35  ;;  %v822_v49 = vld [vmem:[%s1053_s5 + $0x28] sm:$0xff]   ;;  %v823_v50 = vld [vmem:[%s1053_s5 + $0x20] sm:$0xff]   ;;  %v825_v52 = vld [vmem:[%s1053_s5 + $0x10] sm:$0xff]  }
  0x11   :  { %701 = vmatpush3.bf16.msra.mxu1 %v791_v15  ;;  %680 = vmatprep.subr.bf16.mxu0 %v792_v16  ;;  %v617_v55 = vld [vmem:[%s1054_s2] ss:$0 sm:$0xff]  ;;  %v826_v4 = vld [vmem:[%s1053_s5 + $0x8] sm:$0xff]  }
  0x12   :  { %702 = vmatprep.subr.bf16.mxu1 %v793_v17  ;;  %378 = vmatprep.mubr.bf16.mxu1 %v621_v37  ;;  %v827_v5 = vld [vmem:[%s1053_s5] sm:$0xff]  }
  0x13   :  { %v654_v6 = vld [vmem:[%s1055_s4] ss:$0 sm:$0xff] }
  0x14   :  { %681 = vmatpush3.bf16.msra.mxu0 %v794_v18  ;;  %v663_v14 = vld [vmem:[%s1056_s6] ss:$0 sm:$0xff] }
  0x15   :  { %703 = vmatpush3.bf16.msra.mxu1 %v795_v19  ;;  %682 = vmatprep.subr.bf16.mxu0 %v796_v20 }
  0x16   :  { %704 = vmatprep.subr.bf16.mxu1 %v797_v21 }
  0x18   :  { %683 = vmatpush3.bf16.msra.mxu0 %v798_v22 }
  0x19   :  { %705 = vmatpush3.bf16.msra.mxu1 %v799_v23  ;;  %684 = vmatprep.subr.bf16.mxu0 %v800_v24 }
  0x1a   :  { %706 = vmatprep.subr.bf16.mxu1 %v801_v25 }
  0x1c   :  { %685 = vmatpush3.bf16.msra.mxu0 %v802_v26 }
  0x1d   :  { %707 = vmatpush3.bf16.msra.mxu1 %v803_v27  ;;  %686 = vmatprep.subr.bf16.mxu0 %v804_v28 }
  0x1e   :  { %708 = vmatprep.subr.bf16.mxu1 %v805_v29 }
  0x20   :  { %687 = vmatpush3.bf16.msra.mxu0 %v806_v30 }
  0x21   :  { %709 = vmatpush3.bf16.msra.mxu1 %v807_v31  ;;  %734 = vmatprep.subr.bf16.mxu0 %v828_v39 }
  0x22   :  { %754 = vmatprep.subr.bf16.mxu1 %v828_v39 }
  0x23   :  { %339 = vmatmul.mubr.bf16.vlgmr.msra.gmra.mxu0 %v618_v34 }
  0x24   :  { %379 = vmatmul.mubr.bf16.vlgmr.msra.gmra.mxu1 %v620_v36  ;;  %735 = vmatpush3.bf16.msra.mxu0 %v812_v38 }
  0x25   :  { %736 = vmatprep.subr.bf16.mxu0 %v828_v39  ;;  %750 = vmatprep.mubr.msk.bf16.mxu0 %vm829_vm0, %v828_v39 }
  0x26   :  { %770 = vmatprep.mubr.msk.bf16.mxu1 %vm829_vm0, %v828_v39  ;;  %755 = vmatpush3.bf16.msra.mxu1 %v820_v47 }
  0x27   :  { %756 = vmatprep.subr.bf16.mxu1 %v828_v39 }
  0x28   :  { %737 = vmatpush3.bf16.msra.mxu0 %v813_v40 }
  0x29   :  { %738 = vmatprep.subr.bf16.mxu0 %v828_v39 }
  0x2a   :  { %757 = vmatpush3.bf16.msra.mxu1 %v821_v48 }
  0x2b   :  { %758 = vmatprep.subr.bf16.mxu1 %v828_v39 }
  0x2c   :  { %739 = vmatpush3.bf16.msra.mxu0 %v814_v41 }
  0x2d   :  { %740 = vmatprep.subr.bf16.mxu0 %v828_v39 }
  0x2e   :  { %759 = vmatpush3.bf16.msra.mxu1 %v822_v49 }
  0x2f   :  { %760 = vmatprep.subr.bf16.mxu1 %v828_v39 }
  0x30   :  { %741 = vmatpush3.bf16.msra.mxu0 %v815_v42 }
  0x31   :  { %742 = vmatprep.subr.bf16.mxu0 %v828_v39 }
  0x32   :  { %761 = vmatpush3.bf16.msra.mxu1 %v823_v50 }
  0x33   :  { %762 = vmatprep.subr.bf16.mxu1 %v828_v39 }
  0x34   :  { %743 = vmatpush3.bf16.msra.mxu0 %v816_v43 }
  0x35   :  { %744 = vmatprep.subr.bf16.mxu0 %v828_v39 }
  0x36   :  { %763 = vmatpush3.bf16.msra.mxu1 %v824_v51 }
  0x37   :  { %764 = vmatprep.subr.bf16.mxu1 %v828_v39 }
  0x38   :  { %745 = vmatpush3.bf16.msra.mxu0 %v817_v44 }
  0x39   :  { %746 = vmatprep.subr.bf16.mxu0 %v828_v39 }
  0x3a   :  { %765 = vmatpush3.bf16.msra.mxu1 %v825_v52 }
  0x3b   :  { %766 = vmatprep.subr.bf16.mxu1 %v828_v39 }
  0x3c   :  { %747 = vmatpush3.bf16.msra.mxu0 %v818_v45 }
  0x3d   :  { %748 = vmatprep.subr.bf16.mxu0 %v828_v39 }
  0x3e   :  { %767 = vmatpush3.bf16.msra.mxu1 %v826_v4 }
  0x3f   :  { %768 = vmatprep.subr.bf16.mxu1 %v828_v39 }
  0x40   :  { %749 = vmatpush3.bf16.msra.mxu0 %v819_v46 }
  0x42   :  { %769 = vmatpush3.bf16.msra.mxu1 %v827_v5 }
  0xe3   :  { %v688_v53 = vpop.f32.mrf.mxu0 }
  0xe4   :  { %v710_v54 = vpop.f32.mrf.mxu1 }
  0xe5   :  { %v689_v56 = vpop.f32.mrf.mxu0 }
  0xe6   :  { %v711_v57 = vpop.f32.mrf.mxu1  ;;  %v690_v58 = vadd.f32 %v689_v56, %v688_v53 }
  0xe7   :  { %v691_v59 = vpop.f32.mrf.mxu0  ;;  %v712_v62 = vadd.f32 %v711_v57, %v710_v54 }
  0xe8   :  { %v713_v60 = vpop.f32.mrf.mxu1  ;;  %v341_v61 = vadd.f32 %v690_v58, %v617_v55 }
  0xe9   :  { %v692_v63 = vpop.f32.mrf.mxu0 }
  0xea   :  { %v714_v0 = vpop.f32.mrf.mxu1  ;;  %v381_v1 = vadd.f32 %v712_v62, %v341_v61 }
  0xec   :  { %v386_v2 = vmax.f32 %v381_v1, 0.0 }
  0xee   :  { %v387_v3 = vpack.c.bf16 %v386_v2, %v386_v2 }
  0xf0   :  { %751 = vmatmul.mubr.bf16.vlgmr.msra.gmra.mxu0 %v387_v3 }
 0x1b0   :  { %v493_v7 = vpop.f32.mrf.mxu0 }
 0x1b1   :  { %v494_v8 = vadd.f32 %v654_v6, %v493_v7 }
 0x1b2   :  { %v752_v9 = vpop.f32.mrf.mxu0 }
 0x1b3   :  { %v499_v10 = vmax.f32 %v494_v8, 0.0 }
 0x1b4   :  { %v496_v11 = vpop.f32.mrf.mxu0 }
 0x1b5   :  { %v500_v12 = vpack.c.bf16 %v499_v10, %v499_v10 }
 0x1b6   :  { %v753_v13 = vpop.f32.mrf.mxu0 }
 0x1b7   :  { %771 = vmatmul.mubr.bf16.vlgmr.msra.gmra.mxu1 %v500_v12 }
 0x277   :  { %v606_v15 = vpop.f32.mrf.mxu1 }
 0x278   :  { %v607_v16 = vadd.f32 %v663_v14, %v606_v15 }
 0x279   :  { %v772_v17 = vpop.f32.mrf.mxu1 }
 0x27a   :  { %612 = vst [vmem:[%s1057_s7] sm:$0xff] %v607_v16 }
 0x27b   :  { %v609_v18 = vpop.f32.mrf.mxu1 }
 0x27d   :  { %v773_v19 = vpop.f32.mrf.mxu1 }

</bundles_post_ra>
